<compile_context>
chip_gen: v7x
topology: tpu7x:2x2x1
jax: 0.10.0
libtpu: 0.0.40
codegen_flags: <defaults>
</compile_context>

<pallas_src>
import functools

import jax
import jax.numpy as jnp
from jax import lax
from jax.experimental import pallas as pl
from jax.experimental.pallas import tpu as pltpu

LN_EPS = 1e-5
ADAPTER_SCALE = 0.5  # TODO(synk): `self.scale` is not defined in the provided
                     # AdapterBlock3D.__init__; SAM-Med3D uses 0.5 for the MLP_Adapter branch.
# TODO(synk): the `Adapter` class is not provided; the standard SAM adapter is assumed
# (Linear(dim, dim//4) -> GELU -> Linear(dim//4, dim); skip connection on for
#  Attention_Adapter, off for MLP_Adapter).
# TODO(synk): window_partition3D / window_unpartition3D and add_decomposed_rel_pos are not
# implemented because the module defaults (window_size=0, use_rel_pos=False) never use them.


def _erf(x):
    # Abramowitz & Stegun 7.1.26 rational approximation (max abs err ~1.5e-7).
    # Keeps the exact-erf semantics of torch.nn.GELU() while using only ops that are
    # guaranteed to lower in Mosaic (abs, exp, div, select).
    a1, a2, a3, a4, a5 = 0.254829592, -0.284496736, 1.421413741, -1.453152027, 1.061405429
    p = 0.3275911
    ax = jnp.abs(x)
    t = 1.0 / (1.0 + p * ax)
    poly = ((((a5 * t + a4) * t + a3) * t + a2) * t + a1) * t
    y = 1.0 - poly * jnp.exp(-ax * ax)
    return jnp.where(x < 0, -y, y)


def _gelu(x):
    # exact (erf-based) GELU, matching torch.nn.GELU() default
    return x * 0.5 * (1.0 + _erf(x * 0.7071067811865476))


def _layer_norm(x, g, b):
    mu = jnp.mean(x, axis=-1, keepdims=True)
    var = jnp.mean(jnp.square(x - mu), axis=-1, keepdims=True)
    return (x - mu) * lax.rsqrt(var + LN_EPS) * g + b


# --------------------------------------------------------------------------------------
# Pass 1: LayerNorm1 + fused full-width qkv projection -> head-major q/k/v
# --------------------------------------------------------------------------------------
def _ln_qkv_kernel(x_ref, ln1_g, ln1_b, wqkv, bqkv, q_out, k_out, v_out,
                   *, num_heads, compute_dtype):
    x = x_ref[...].astype(jnp.float32)                               # (t, C)
    xn = _layer_norm(x, ln1_g[...], ln1_b[...]).astype(compute_dtype)
    # ONE (t, C) @ (C, 3C) matmul: full MXU width instead of 3*nh tiny per-head matmuls.
    qkv = (jnp.dot(xn, wqkv[...], preferred_element_type=jnp.float32)
           + bqkv[...]).astype(compute_dtype)                        # (t, 3C)
    C = x.shape[-1]
    hd = C // num_heads
    for h in range(num_heads):                                       # cheap static lane-slice copies
        q_out[h] = qkv[:, 0 * C + h * hd:0 * C + (h + 1) * hd]
        k_out[h] = qkv[:, 1 * C + h * hd:1 * C + (h + 1) * hd]
        v_out[h] = qkv[:, 2 * C + h * hd:2 * C + (h + 1) * hd]


# --------------------------------------------------------------------------------------
# Pass 2: flash attention (online softmax over kv tiles) + head merge
# --------------------------------------------------------------------------------------
def _flash_attn_kernel(q_ref, k_ref, v_ref, o_ref, m_sc, l_sc, acc_sc, *, compute_dtype):
    kj = pl.program_id(2)

    @pl.when(kj == 0)
    def _():
        m_sc[...] = jnp.full(m_sc.shape, -jnp.inf, m_sc.dtype)
        l_sc[...] = jnp.zeros(l_sc.shape, l_sc.dtype)
        acc_sc[...] = jnp.zeros(acc_sc.shape, acc_sc.dtype)

    q = q_ref[...]                                                   # (nh, tq, hd), scale pre-folded
    k = k_ref[...]                                                   # (nh, tkv, hd)
    v = v_ref[...]                                                   # (nh, tkv, hd)
    s = jnp.einsum('htd,hkd->htk', q, k,
                   preferred_element_type=jnp.float32)               # (nh, tq, tkv), f32

    m_prev = m_sc[...]                                               # (nh, tq)
    m_new = jnp.maximum(m_prev, jnp.max(s, axis=-1))
    alpha = jnp.exp(m_prev - m_new)                                  # (nh, tq)
    p = jnp.exp(s - m_new[:, :, None])                               # (nh, tq, tkv)
    l_sc[...] = alpha * l_sc[...] + jnp.sum(p, axis=-1)
    acc_sc[...] = (alpha[:, :, None] * acc_sc[...]
                   + jnp.einsum('htk,hkd->htd', p.astype(compute_dtype), v,
                                preferred_element_type=jnp.float32))
    m_sc[...] = m_new

    @pl.when(kj == pl.num_programs(2) - 1)
    def _():
        num_heads = acc_sc.shape[0]
        acc_n = acc_sc[...] / l_sc[...][:, :, None]                  # exact normalization
        # merge heads (lane concat) -> lane-dense (tq, C) store; projection happens in pass 3
        ctx = jnp.concatenate([acc_n[h] for h in range(num_heads)], axis=-1)
        o_ref[...] = ctx.astype(o_ref.dtype)


# --------------------------------------------------------------------------------------
# Pass 3: output projection + Attention_Adapter + residual + norm2 + MLP + MLP_Adapter
# --------------------------------------------------------------------------------------
def _proj_mlp_kernel(x_ref, ctx_ref, proj_w, proj_b, aa1_w, aa1_b, aa2_w, aa2_b,
                     ln2_g, ln2_b, mlp1_w, mlp1_b, mlp2_w, mlp2_b,
                     ma1_w, ma1_b, ma2_w, ma2_b, out_ref,
                     *, compute_dtype, mlp_chunk):
    x = x_ref[...].astype(jnp.float32)                               # (t, C) residual input
    ctx = ctx_ref[...]                                               # (t, C) attention context

    # output projection: single full-width (t, C) @ (C, C) MXU matmul
    o = jnp.dot(ctx, proj_w[...], preferred_element_type=jnp.float32) + proj_b[...]

    # Attention_Adapter (skip_connection=True)
    a = _gelu(jnp.dot(o.astype(compute_dtype), aa1_w[...],
                      preferred_element_type=jnp.float32) + aa1_b[...])
    o = o + (jnp.dot(a.astype(compute_dtype), aa2_w[...],
                     preferred_element_type=jnp.float32) + aa2_b[...])

    # residual
    x1 = x + o

    # norm2
    xn2 = _layer_norm(x1, ln2_g[...], ln2_b[...])
    xn2_c = xn2.astype(compute_dtype)

    # MLP: hidden dimension processed in chunks so the (t, chunk) f32 intermediate is small
    mlp_dim = mlp1_w.shape[1]
    mo = jnp.zeros_like(x1)
    for c0 in range(0, mlp_dim, mlp_chunk):
        c1 = min(c0 + mlp_chunk, mlp_dim)
        h = _gelu(jnp.dot(xn2_c, mlp1_w[:, c0:c1],
                          preferred_element_type=jnp.float32) + mlp1_b[:, c0:c1])
        mo = mo + jnp.dot(h.astype(compute_dtype), mlp2_w[c0:c1, :],
                          preferred_element_type=jnp.float32)
    mo = mo + mlp2_b[...]

    # MLP_Adapter (skip_connection=False), scaled
    ah = _gelu(jnp.dot(xn2_c, ma1_w[...],
                       preferred_element_type=jnp.float32) + ma1_b[...])
    ao = jnp.dot(ah.astype(compute_dtype), ma2_w[...],
                 preferred_element_type=jnp.float32) + ma2_b[...]

    out_ref[...] = (x1 + mo + ADAPTER_SCALE * ao).astype(out_ref.dtype)


# --------------------------------------------------------------------------------------
# Wrapper
# --------------------------------------------------------------------------------------
def _pick_tile(n, target):
    """Largest divisor of n that is <= target (preferring multiples of 8)."""
    if n <= target:
        return n
    best_any = None
    for cand in range(min(target, n), 0, -1):
        if n % cand == 0:
            if cand % 8 == 0:
                return cand
            if best_any is None:
                best_any = cand
    return best_any if best_any is not None else n


def _const_spec(arr):
    nd = arr.ndim
    return pl.BlockSpec(arr.shape, lambda *args, _nd=nd: (0,) * _nd)


def _vmem_limit_bytes():
    # Narrow guard around the device query only (never around kernel compilation).
    try:
        cap = pltpu.get_tpu_info().vmem_capacity_bytes
        return min(int(cap * 0.9), 128 * 1024 * 1024)
    except Exception:
        return 64 * 1024 * 1024


def adapter_block3d(x, params, num_heads, *, compute_dtype=jnp.bfloat16,
                    token_tile=512, q_tile=512, kv_tile=512,
                    epilogue_tile=256, mlp_chunk=512):
    """Forward pass of AdapterBlock3D (window_size=0, use_rel_pos=False)."""
    B, D, H, W, C = x.shape
    N = D * H * W
    assert C % num_heads == 0
    hd = C // num_heads
    nh = num_heads
    f32 = jnp.float32
    cdt = compute_dtype

    t_tok = _pick_tile(N, token_tile)
    tq = _pick_tile(N, q_tile)       # larger q tiles -> fewer K/V HBM re-reads (helps v5e)
    tkv = _pick_tile(N, kv_tile)
    t_epi = _pick_tile(N, epilogue_tile)
    nt, nq, nkv, nepi = N // t_tok, N // tq, N // tkv, N // t_epi

    xf = x.reshape(B, N, C)

    # ---- host-side parameter prep (cast / fold only) ----
    scale = hd ** -0.5
    col_scale = jnp.concatenate([jnp.full((C,), scale, f32), jnp.ones((2 * C,), f32)])
    # attention scale folded into the q columns of the fused qkv weight/bias (free, host-side)
    wqkv = (params["qkv_w"].astype(f32) * col_scale[None, :]).astype(cdt)   # (C, 3C)
    bqkv = params["qkv_b"].astype(f32).reshape(1, 3 * C) * col_scale[None, :]

    ln1_g = params["ln1_g"].astype(f32); ln1_b = params["ln1_b"].astype(f32)
    ln2_g = params["ln2_g"].astype(f32); ln2_b = params["ln2_b"].astype(f32)
    proj_w = params["proj_w"].astype(cdt); proj_b = params["proj_b"].astype(f32)
    aa1_w = params["aa1_w"].astype(cdt); aa1_b = params["aa1_b"].astype(f32)
    aa2_w = params["aa2_w"].astype(cdt); aa2_b = params["aa2_b"].astype(f32)
    mlp1_w = params["mlp1_w"].astype(cdt); mlp1_b = params["mlp1_b"].astype(f32)
    mlp2_w = params["mlp2_w"].astype(cdt); mlp2_b = params["mlp2_b"].astype(f32)
    ma1_w = params["ma1_w"].astype(cdt); ma1_b = params["ma1_b"].astype(f32)
    ma2_w = params["ma2_w"].astype(cdt); ma2_b = params["ma2_b"].astype(f32)

    qkv_weights = (ln1_g, ln1_b, wqkv, bqkv)
    epi_weights = (proj_w, proj_b, aa1_w, aa1_b, aa2_w, aa2_b,
                   ln2_g, ln2_b, mlp1_w, mlp1_b, mlp2_w, mlp2_b,
                   ma1_w, ma1_b, ma2_w, ma2_b)

    vmem_limit = _vmem_limit_bytes()
    mlp_chunk_eff = max(8, min(int(mlp_chunk), int(mlp1_w.shape[1])))

    # ---- pass 1: LayerNorm1 + fused qkv projection -> head-major q/k/v ----
    q, k, v = pl.pallas_call(
        functools.partial(_ln_qkv_kernel, num_heads=nh, compute_dtype=cdt),
        out_shape=[jax.ShapeDtypeStruct((B, nh, N, hd), cdt) for _ in range(3)],
        grid=(B, nt),
        in_specs=[pl.BlockSpec((None, t_tok, C), lambda b, i: (b, i, 0))]
                 + [_const_spec(w) for w in qkv_weights],
        out_specs=[pl.BlockSpec((None, nh, t_tok, hd), lambda b, i: (b, 0, i, 0))
                   for _ in range(3)],
        compiler_params=pltpu.CompilerParams(
            dimension_semantics=("parallel", "parallel"),
            vmem_limit_bytes=vmem_limit),
    )(xf, *qkv_weights)

    # ---- pass 2: flash attention over kv tiles, head merge (no weights resident) ----
    ctx = pl.pallas_call(
        functools.partial(_flash_attn_kernel, compute_dtype=cdt),
        out_shape=jax.ShapeDtypeStruct((B, N, C), cdt),
        grid=(B, nq, nkv),
        in_specs=[pl.BlockSpec((None, nh, tq, hd), lambda b, qi, kj: (b, 0, qi, 0)),
                  pl.BlockSpec((None, nh, tkv, hd), lambda b, qi, kj: (b, 0, kj, 0)),
                  pl.BlockSpec((None, nh, tkv, hd), lambda b, qi, kj: (b, 0, kj, 0))],
        out_specs=pl.BlockSpec((None, tq, C), lambda b, qi, kj: (b, qi, 0)),
        scratch_shapes=[pltpu.VMEM((nh, tq), jnp.float32),       # running max (2-D, no padded lanes)
                        pltpu.VMEM((nh, tq), jnp.float32),       # running denominator
                        pltpu.VMEM((nh, tq, hd), jnp.float32)],  # output accumulator
        compiler_params=pltpu.CompilerParams(
            dimension_semantics=("parallel", "parallel", "arbitrary"),
            vmem_limit_bytes=vmem_limit),
    )(q, k, v)

    # ---- pass 3: proj + Attention_Adapter + residual + norm2 + MLP + MLP_Adapter ----
    out = pl.pallas_call(
        functools.partial(_proj_mlp_kernel, compute_dtype=cdt, mlp_chunk=mlp_chunk_eff),
        out_shape=jax.ShapeDtypeStruct((B, N, C), x.dtype),
        grid=(B, nepi),
        in_specs=[pl.BlockSpec((None, t_epi, C), lambda b, i: (b, i, 0)),
                  pl.BlockSpec((None, t_epi, C), lambda b, i: (b, i, 0))]
                 + [_const_spec(w) for w in epi_weights],
        out_specs=pl.BlockSpec((None, t_epi, C), lambda b, i: (b, i, 0)),
        compiler_params=pltpu.CompilerParams(
            dimension_semantics=("parallel", "parallel"),
            vmem_limit_bytes=vmem_limit),
    )(xf, ctx, *epi_weights)

    return out.reshape(B, D, H, W, C)


# --------------------------------------------------------------------------------------
# Parameters + pure-JAX reference
# --------------------------------------------------------------------------------------
def init_params(key, dim, mlp_ratio=4.0, adapter_ratio=0.25):
    mlp_dim = int(dim * mlp_ratio)
    a_dim = int(dim * adapter_ratio)
    keys = jax.random.split(key, 12)

    def lin(k, din, dout):
        k1, k2 = jax.random.split(k)
        w = jax.random.normal(k1, (din, dout), jnp.float32) * 0.02
        b = jax.random.normal(k2, (1, dout), jnp.float32) * 0.02
        return w, b

    p = {}
    p["ln1_g"] = 1.0 + 0.02 * jax.random.normal(keys[8], (1, dim), jnp.float32)
    p["ln1_b"] = 0.02 * jax.random.normal(keys[9], (1, dim), jnp.float32)
    p["ln2_g"] = 1.0 + 0.02 * jax.random.normal(keys[10], (1, dim), jnp.float32)
    p["ln2_b"] = 0.02 * jax.random.normal(keys[11], (1, dim), jnp.float32)
    p["qkv_w"], p["qkv_b"] = lin(keys[0], dim, 3 * dim)
    p["proj_w"], p["proj_b"] = lin(keys[1], dim, dim)
    p["aa1_w"], p["aa1_b"] = lin(keys[2], dim, a_dim)
    p["aa2_w"], p["aa2_b"] = lin(keys[3], a_dim, dim)
    p["mlp1_w"], p["mlp1_b"] = lin(keys[4], dim, mlp_dim)
    p["mlp2_w"], p["mlp2_b"] = lin(keys[5], mlp_dim, dim)
    p["ma1_w"], p["ma1_b"] = lin(keys[6], dim, a_dim)
    p["ma2_w"], p["ma2_b"] = lin(keys[7], a_dim, dim)
    return p


def reference(x, p, num_heads):
    # pure-JAX f32 reference mirroring the PyTorch forward (window_size=0, no rel-pos)
    B, D, H, W, C = x.shape
    N = D * H * W
    hd = C // num_heads
    gelu = lambda v: jax.nn.gelu(v, approximate=False)   # exact erf GELU (torch default)

    def ln(v, g, b):
        mu = v.mean(-1, keepdims=True)
        var = ((v - mu) ** 2).mean(-1, keepdims=True)
        return (v - mu) / jnp.sqrt(var + LN_EPS) * g + b

    xf = x.reshape(B, N, C)
    shortcut = xf
    xn = ln(xf, p["ln1_g"], p["ln1_b"])
    qkv = xn @ p["qkv_w"] + p["qkv_b"]
    qkv = qkv.reshape(B, N, 3, num_heads, hd).transpose(2, 0, 3, 1, 4)
    q, k, v = qkv[0], qkv[1], qkv[2]
    attn = (q * hd ** -0.5) @ jnp.swapaxes(k, -1, -2)
    attn = jax.nn.softmax(attn, axis=-1)
    o = (attn @ v).transpose(0, 2, 1, 3).reshape(B, N, C)
    o = o @ p["proj_w"] + p["proj_b"]
    a = gelu(o @ p["aa1_w"] + p["aa1_b"]) @ p["aa2_w"] + p["aa2_b"]
    o = o + a
    x1 = shortcut + o
    xn2 = ln(x1, p["ln2_g"], p["ln2_b"])
    m = gelu(xn2 @ p["mlp1_w"] + p["mlp1_b"]) @ p["mlp2_w"] + p["mlp2_b"]
    ma = gelu(xn2 @ p["ma1_w"] + p["ma1_b"]) @ p["ma2_w"] + p["ma2_b"]
    return (x1 + m + ADAPTER_SCALE * ma).reshape(B, D, H, W, C)


if __name__ == "__main__":
    key = jax.random.PRNGKey(0)
    kx, kp = jax.random.split(key)

    B, D, H, W, C = 2, 4, 4, 8, 32          # N = 128 tokens
    num_heads = 4

    x = jax.random.normal(kx, (B, D, H, W, C), jnp.float32)
    params = init_params(kp, C)

    # small tiles so token / q / kv / epilogue tiling and MLP hidden-chunking are exercised
    out = adapter_block3d(x, params, num_heads,
                          token_tile=64, q_tile=64, kv_tile=64,
                          epilogue_tile=64, mlp_chunk=64)
    out = jax.block_until_ready(out)

    ref = reference(x, params, num_heads)
    assert out.shape == (B, D, H, W, C)
    max_err = float(jnp.max(jnp.abs(out - ref)))
    # bf16 MXU inputs with f32 accumulation (LN / softmax stats in f32) -> loosened tolerance
    assert jnp.allclose(out, ref, atol=2e-2, rtol=2e-2), f"max abs err {max_err}"

    print("KERNEL_OK")
</pallas_src>

<mosaic_0001>
module attributes {stable_mosaic.version = 11 : i64} {
  func.func @_ln_qkv_kernel(%arg0: i32, %arg1: i32, %arg2: memref<1x64x32xf32, #tpu.memory_space<vmem>>, %arg3: memref<1x32xf32, #tpu.memory_space<vmem>>, %arg4: memref<1x32xf32, #tpu.memory_space<vmem>>, %arg5: memref<32x96xbf16, #tpu.memory_space<vmem>>, %arg6: memref<1x96xf32, #tpu.memory_space<vmem>>, %arg7: memref<1x4x64x8xbf16, #tpu.memory_space<vmem>>, %arg8: memref<1x4x64x8xbf16, #tpu.memory_space<vmem>>, %arg9: memref<1x4x64x8xbf16, #tpu.memory_space<vmem>>) attributes {dimension_semantics = [#tpu.dimension_semantics<parallel>, #tpu.dimension_semantics<parallel>], iteration_bounds = array<i64: 2, 2>, scalar_prefetch = 0 : i64, scratch_operands = 0 : i64, tpu.core_type = #tpu.core_type<tc>, window_params = [{transform_indices = @transform_0, window_bounds = array<i64: 1, 64, 32>}, {pipeline_mode = #tpu.pipeline_mode<synchronous>, transform_indices = @transform_1, window_bounds = array<i64: 1, 32>}, {pipeline_mode = #tpu.pipeline_mode<synchronous>, transform_indices = @transform_2, window_bounds = array<i64: 1, 32>}, {pipeline_mode = #tpu.pipeline_mode<synchronous>, transform_indices = @transform_3, window_bounds = array<i64: 32, 96>}, {pipeline_mode = #tpu.pipeline_mode<synchronous>, transform_indices = @transform_4, window_bounds = array<i64: 1, 96>}, {transform_indices = @transform_5, window_bounds = array<i64: 1, 4, 64, 8>}, {transform_indices = @transform_6, window_bounds = array<i64: 1, 4, 64, 8>}, {transform_indices = @transform_7, window_bounds = array<i64: 1, 4, 64, 8>}]} {
    %c0 = arith.constant 0 : index
    %c0_0 = arith.constant 0 : index
    %c0_1 = arith.constant 0 : index
    %0 = vector.load %arg2[%c0, %c0_0, %c0_1] : memref<1x64x32xf32, #tpu.memory_space<vmem>>, vector<1x64x32xf32>
    %1 = vector.shape_cast %0 : vector<1x64x32xf32> to vector<64x32xf32>
    %c0_2 = arith.constant 0 : index
    %c0_3 = arith.constant 0 : index
    %2 = vector.load %arg3[%c0_2, %c0_3] : memref<1x32xf32, #tpu.memory_space<vmem>>, vector<1x32xf32>
    %c0_4 = arith.constant 0 : index
    %c0_5 = arith.constant 0 : index
    %3 = vector.load %arg4[%c0_4, %c0_5] : memref<1x32xf32, #tpu.memory_space<vmem>>, vector<1x32xf32>
    %cst = arith.constant dense<0.000000e+00> : vector<64xf32>
    %4 = vector.multi_reduction <add>, %1, %cst [1] : vector<64x32xf32> to vector<64xf32>
    %5 = vector.shape_cast %4 : vector<64xf32> to vector<64x1xf32>
    %cst_6 = arith.constant 3.200000e+01 : f32
    %6 = vector.broadcast %cst_6 : f32 to vector<64x1xf32>
    %7 = arith.divf %5, %6 : vector<64x1xf32>
    %8 = vector.broadcast %7 : vector<64x1xf32> to vector<64x32xf32>
    %9 = arith.subf %1, %8 : vector<64x32xf32>
    %10 = arith.mulf %9, %9 : vector<64x32xf32>
    %cst_7 = arith.constant dense<0.000000e+00> : vector<64xf32>
    %11 = vector.multi_reduction <add>, %10, %cst_7 [1] : vector<64x32xf32> to vector<64xf32>
    %12 = vector.shape_cast %11 : vector<64xf32> to vector<64x1xf32>
    %cst_8 = arith.constant 3.200000e+01 : f32
    %13 = vector.broadcast %cst_8 : f32 to vector<64x1xf32>
    %14 = arith.divf %12, %13 : vector<64x1xf32>
    %15 = vector.broadcast %7 : vector<64x1xf32> to vector<64x32xf32>
    %16 = arith.subf %1, %15 : vector<64x32xf32>
    %cst_9 = arith.constant 9.99999974E-6 : f32
    %17 = vector.broadcast %cst_9 : f32 to vector<64x1xf32>
    %18 = arith.addf %14, %17 : vector<64x1xf32>
    %19 = math.rsqrt %18 : vector<64x1xf32>
    %20 = vector.broadcast %19 : vector<64x1xf32> to vector<64x32xf32>
    %21 = arith.mulf %16, %20 : vector<64x32xf32>
    %22 = vector.broadcast %2 : vector<1x32xf32> to vector<64x32xf32>
    %23 = arith.mulf %21, %22 : vector<64x32xf32>
    %24 = vector.broadcast %3 : vector<1x32xf32> to vector<64x32xf32>
    %25 = arith.addf %23, %24 : vector<64x32xf32>
    %26 = arith.truncf %25 : vector<64x32xf32> to vector<64x32xbf16>
    %c0_10 = arith.constant 0 : index
    %c0_11 = arith.constant 0 : index
    %27 = vector.load %arg5[%c0_10, %c0_11] : memref<32x96xbf16, #tpu.memory_space<vmem>>, vector<32x96xbf16>
    %cst_12 = arith.constant dense<0.000000e+00> : vector<64x96xf32>
    %28 = tpu.matmul %26, %27, %cst_12 {dimension_numbers = #tpu.dot_dimension_numbers<[1], [0], [0], [1], [0, 0, 1, 1], [], []>} : vector<64x32xbf16>, vector<32x96xbf16>, vector<64x96xf32> -> vector<64x96xf32>
    %c0_13 = arith.constant 0 : index
    %c0_14 = arith.constant 0 : index
    %29 = vector.load %arg6[%c0_13, %c0_14] : memref<1x96xf32, #tpu.memory_space<vmem>>, vector<1x96xf32>
    %30 = vector.broadcast %29 : vector<1x96xf32> to vector<64x96xf32>
    %31 = arith.addf %28, %30 : vector<64x96xf32>
    %32 = arith.truncf %31 : vector<64x96xf32> to vector<64x96xbf16>
    %33 = vector.extract_strided_slice %32 {offsets = [0, 0], sizes = [64, 8], strides = [1, 1]} : vector<64x96xbf16> to vector<64x8xbf16>
    %c0_15 = arith.constant 0 : index
    %c0_16 = arith.constant 0 : index
    %c0_17 = arith.constant 0 : index
    %c0_18 = arith.constant 0 : index
    %34 = vector.load %arg7[%c0_15, %c0_16, %c0_17, %c0_18] : memref<1x4x64x8xbf16, #tpu.memory_space<vmem>>, vector<1x1x64x8xbf16>
    %35 = vector.shape_cast %34 : vector<1x1x64x8xbf16> to vector<64x8xbf16>
    %36 = vector.shape_cast %33 : vector<64x8xbf16> to vector<1x1x64x8xbf16>
    tpu.vector_store %arg7[%c0_15, %c0_16, %c0_17, %c0_18], %36 {strides = array<i32>} : memref<1x4x64x8xbf16, #tpu.memory_space<vmem>>, vector<1x1x64x8xbf16>,
    %37 = vector.extract_strided_slice %32 {offsets = [0, 32], sizes = [64, 8], strides = [1, 1]} : vector<64x96xbf16> to vector<64x8xbf16>
    %c0_19 = arith.constant 0 : index
    %c0_20 = arith.constant 0 : index
    %c0_21 = arith.constant 0 : index
    %c0_22 = arith.constant 0 : index
    %38 = vector.load %arg8[%c0_19, %c0_20, %c0_21, %c0_22] : memref<1x4x64x8xbf16, #tpu.memory_space<vmem>>, vector<1x1x64x8xbf16>
    %39 = vector.shape_cast %38 : vector<1x1x64x8xbf16> to vector<64x8xbf16>
    %40 = vector.shape_cast %37 : vector<64x8xbf16> to vector<1x1x64x8xbf16>
    tpu.vector_store %arg8[%c0_19, %c0_20, %c0_21, %c0_22], %40 {strides = array<i32>} : memref<1x4x64x8xbf16, #tpu.memory_space<vmem>>, vector<1x1x64x8xbf16>,
    %41 = vector.extract_strided_slice %32 {offsets = [0, 64], sizes = [64, 8], strides = [1, 1]} : vector<64x96xbf16> to vector<64x8xbf16>
    %c0_23 = arith.constant 0 : index
    %c0_24 = arith.constant 0 : index
    %c0_25 = arith.constant 0 : index
    %c0_26 = arith.constant 0 : index
    %42 = vector.load %arg9[%c0_23, %c0_24, %c0_25, %c0_26] : memref<1x4x64x8xbf16, #tpu.memory_space<vmem>>, vector<1x1x64x8xbf16>
    %43 = vector.shape_cast %42 : vector<1x1x64x8xbf16> to vector<64x8xbf16>
    %44 = vector.shape_cast %41 : vector<64x8xbf16> to vector<1x1x64x8xbf16>
    tpu.vector_store %arg9[%c0_23, %c0_24, %c0_25, %c0_26], %44 {strides = array<i32>} : memref<1x4x64x8xbf16, #tpu.memory_space<vmem>>, vector<1x1x64x8xbf16>,
    %45 = vector.extract_strided_slice %32 {offsets = [0, 8], sizes = [64, 8], strides = [1, 1]} : vector<64x96xbf16> to vector<64x8xbf16>
    %c0_27 = arith.constant 0 : index
    %c1 = arith.constant 1 : index
    %c0_28 = arith.constant 0 : index
    %c0_29 = arith.constant 0 : index
    %46 = vector.load %arg7[%c0_27, %c1, %c0_28, %c0_29] : memref<1x4x64x8xbf16, #tpu.memory_space<vmem>>, vector<1x1x64x8xbf16>
    %47 = vector.shape_cast %46 : vector<1x1x64x8xbf16> to vector<64x8xbf16>
    %48 = vector.shape_cast %45 : vector<64x8xbf16> to vector<1x1x64x8xbf16>
    tpu.vector_store %arg7[%c0_27, %c1, %c0_28, %c0_29], %48 {strides = array<i32>} : memref<1x4x64x8xbf16, #tpu.memory_space<vmem>>, vector<1x1x64x8xbf16>,
    %49 = vector.extract_strided_slice %32 {offsets = [0, 40], sizes = [64, 8], strides = [1, 1]} : vector<64x96xbf16> to vector<64x8xbf16>
    %c0_30 = arith.constant 0 : index
    %c1_31 = arith.constant 1 : index
    %c0_32 = arith.constant 0 : index
    %c0_33 = arith.constant 0 : index
    %50 = vector.load %arg8[%c0_30, %c1_31, %c0_32, %c0_33] : memref<1x4x64x8xbf16, #tpu.memory_space<vmem>>, vector<1x1x64x8xbf16>
    %51 = vector.shape_cast %50 : vector<1x1x64x8xbf16> to vector<64x8xbf16>
    %52 = vector.shape_cast %49 : vector<64x8xbf16> to vector<1x1x64x8xbf16>
    tpu.vector_store %arg8[%c0_30, %c1_31, %c0_32, %c0_33], %52 {strides = array<i32>} : memref<1x4x64x8xbf16, #tpu.memory_space<vmem>>, vector<1x1x64x8xbf16>,
    %53 = vector.extract_strided_slice %32 {offsets = [0, 72], sizes = [64, 8], strides = [1, 1]} : vector<64x96xbf16> to vector<64x8xbf16>
    %c0_34 = arith.constant 0 : index
    %c1_35 = arith.constant 1 : index
    %c0_36 = arith.constant 0 : index
    %c0_37 = arith.constant 0 : index
    %54 = vector.load %arg9[%c0_34, %c1_35, %c0_36, %c0_37] : memref<1x4x64x8xbf16, #tpu.memory_space<vmem>>, vector<1x1x64x8xbf16>
    %55 = vector.shape_cast %54 : vector<1x1x64x8xbf16> to vector<64x8xbf16>
    %56 = vector.shape_cast %53 : vector<64x8xbf16> to vector<1x1x64x8xbf16>
    tpu.vector_store %arg9[%c0_34, %c1_35, %c0_36, %c0_37], %56 {strides = array<i32>} : memref<1x4x64x8xbf16, #tpu.memory_space<vmem>>, vector<1x1x64x8xbf16>,
    %57 = vector.extract_strided_slice %32 {offsets = [0, 16], sizes = [64, 8], strides = [1, 1]} : vector<64x96xbf16> to vector<64x8xbf16>
    %c0_38 = arith.constant 0 : index
    %c2 = arith.constant 2 : index
    %c0_39 = arith.constant 0 : index
    %c0_40 = arith.constant 0 : index
    %58 = vector.load %arg7[%c0_38, %c2, %c0_39, %c0_40] : memref<1x4x64x8xbf16, #tpu.memory_space<vmem>>, vector<1x1x64x8xbf16>
    %59 = vector.shape_cast %58 : vector<1x1x64x8xbf16> to vector<64x8xbf16>
    %60 = vector.shape_cast %57 : vector<64x8xbf16> to vector<1x1x64x8xbf16>
    tpu.vector_store %arg7[%c0_38, %c2, %c0_39, %c0_40], %60 {strides = array<i32>} : memref<1x4x64x8xbf16, #tpu.memory_space<vmem>>, vector<1x1x64x8xbf16>,
    %61 = vector.extract_strided_slice %32 {offsets = [0, 48], sizes = [64, 8], strides = [1, 1]} : vector<64x96xbf16> to vector<64x8xbf16>
    %c0_41 = arith.constant 0 : index
    %c2_42 = arith.constant 2 : index
    %c0_43 = arith.constant 0 : index
    %c0_44 = arith.constant 0 : index
    %62 = vector.load %arg8[%c0_41, %c2_42, %c0_43, %c0_44] : memref<1x4x64x8xbf16, #tpu.memory_space<vmem>>, vector<1x1x64x8xbf16>
    %63 = vector.shape_cast %62 : vector<1x1x64x8xbf16> to vector<64x8xbf16>
    %64 = vector.shape_cast %61 : vector<64x8xbf16> to vector<1x1x64x8xbf16>
    tpu.vector_store %arg8[%c0_41, %c2_42, %c0_43, %c0_44], %64 {strides = array<i32>} : memref<1x4x64x8xbf16, #tpu.memory_space<vmem>>, vector<1x1x64x8xbf16>,
    %65 = vector.extract_strided_slice %32 {offsets = [0, 80], sizes = [64, 8], strides = [1, 1]} : vector<64x96xbf16> to vector<64x8xbf16>
    %c0_45 = arith.constant 0 : index
    %c2_46 = arith.constant 2 : index
    %c0_47 = arith.constant 0 : index
    %c0_48 = arith.constant 0 : index
    %66 = vector.load %arg9[%c0_45, %c2_46, %c0_47, %c0_48] : memref<1x4x64x8xbf16, #tpu.memory_space<vmem>>, vector<1x1x64x8xbf16>
    %67 = vector.shape_cast %66 : vector<1x1x64x8xbf16> to vector<64x8xbf16>
    %68 = vector.shape_cast %65 : vector<64x8xbf16> to vector<1x1x64x8xbf16>
    tpu.vector_store %arg9[%c0_45, %c2_46, %c0_47, %c0_48], %68 {strides = array<i32>} : memref<1x4x64x8xbf16, #tpu.memory_space<vmem>>, vector<1x1x64x8xbf16>,
    %69 = vector.extract_strided_slice %32 {offsets = [0, 24], sizes = [64, 8], strides = [1, 1]} : vector<64x96xbf16> to vector<64x8xbf16>
    %c0_49 = arith.constant 0 : index
    %c3 = arith.constant 3 : index
    %c0_50 = arith.constant 0 : index
    %c0_51 = arith.constant 0 : index
    %70 = vector.load %arg7[%c0_49, %c3, %c0_50, %c0_51] : memref<1x4x64x8xbf16, #tpu.memory_space<vmem>>, vector<1x1x64x8xbf16>
    %71 = vector.shape_cast %70 : vector<1x1x64x8xbf16> to vector<64x8xbf16>
    %72 = vector.shape_cast %69 : vector<64x8xbf16> to vector<1x1x64x8xbf16>
    tpu.vector_store %arg7[%c0_49, %c3, %c0_50, %c0_51], %72 {strides = array<i32>} : memref<1x4x64x8xbf16, #tpu.memory_space<vmem>>, vector<1x1x64x8xbf16>,
    %73 = vector.extract_strided_slice %32 {offsets = [0, 56], sizes = [64, 8], strides = [1, 1]} : vector<64x96xbf16> to vector<64x8xbf16>
    %c0_52 = arith.constant 0 : index
    %c3_53 = arith.constant 3 : index
    %c0_54 = arith.constant 0 : index
    %c0_55 = arith.constant 0 : index
    %74 = vector.load %arg8[%c0_52, %c3_53, %c0_54, %c0_55] : memref<1x4x64x8xbf16, #tpu.memory_space<vmem>>, vector<1x1x64x8xbf16>
    %75 = vector.shape_cast %74 : vector<1x1x64x8xbf16> to vector<64x8xbf16>
    %76 = vector.shape_cast %73 : vector<64x8xbf16> to vector<1x1x64x8xbf16>
    tpu.vector_store %arg8[%c0_52, %c3_53, %c0_54, %c0_55], %76 {strides = array<i32>} : memref<1x4x64x8xbf16, #tpu.memory_space<vmem>>, vector<1x1x64x8xbf16>,
    %77 = vector.extract_strided_slice %32 {offsets = [0, 88], sizes = [64, 8], strides = [1, 1]} : vector<64x96xbf16> to vector<64x8xbf16>
    %c0_56 = arith.constant 0 : index
    %c3_57 = arith.constant 3 : index
    %c0_58 = arith.constant 0 : index
    %c0_59 = arith.constant 0 : index
    %78 = vector.load %arg9[%c0_56, %c3_57, %c0_58, %c0_59] : memref<1x4x64x8xbf16, #tpu.memory_space<vmem>>, vector<1x1x64x8xbf16>
    %79 = vector.shape_cast %78 : vector<1x1x64x8xbf16> to vector<64x8xbf16>
    %80 = vector.shape_cast %77 : vector<64x8xbf16> to vector<1x1x64x8xbf16>
    tpu.vector_store %arg9[%c0_56, %c3_57, %c0_58, %c0_59], %80 {strides = array<i32>} : memref<1x4x64x8xbf16, #tpu.memory_space<vmem>>, vector<1x1x64x8xbf16>,
    return
  }
  func.func @transform_0(%arg0: i32, %arg1: i32) -> (i32, i32, i32) {
    %c0_i32 = arith.constant 0 : i32
    %c0_i32_0 = arith.constant 0 : i32
    return %arg0, %arg1, %c0_i32 : i32, i32, i32
  }
  func.func @transform_1(%arg0: i32, %arg1: i32) -> (i32, i32) {
    %c0_i32 = arith.constant 0 : i32
    %c0_i32_0 = arith.constant 0 : i32
    %c0_i32_1 = arith.constant 0 : i32
    return %c0_i32, %c0_i32_0 : i32, i32
  }
  func.func @transform_2(%arg0: i32, %arg1: i32) -> (i32, i32) {
    %c0_i32 = arith.constant 0 : i32
    %c0_i32_0 = arith.constant 0 : i32
    %c0_i32_1 = arith.constant 0 : i32
    return %c0_i32, %c0_i32_0 : i32, i32
  }
  func.func @transform_3(%arg0: i32, %arg1: i32) -> (i32, i32) {
    %c0_i32 = arith.constant 0 : i32
    %c0_i32_0 = arith.constant 0 : i32
    %c0_i32_1 = arith.constant 0 : i32
    return %c0_i32, %c0_i32_0 : i32, i32
  }
  func.func @transform_4(%arg0: i32, %arg1: i32) -> (i32, i32) {
    %c0_i32 = arith.constant 0 : i32
    %c0_i32_0 = arith.constant 0 : i32
    %c0_i32_1 = arith.constant 0 : i32
    return %c0_i32, %c0_i32_0 : i32, i32
  }
  func.func @transform_5(%arg0: i32, %arg1: i32) -> (i32, i32, i32, i32) {
    %c0_i32 = arith.constant 0 : i32
    %c0_i32_0 = arith.constant 0 : i32
    %c0_i32_1 = arith.constant 0 : i32
    return %arg0, %c0_i32, %arg1, %c0_i32_0 : i32, i32, i32, i32
  }
  func.func @transform_6(%arg0: i32, %arg1: i32) -> (i32, i32, i32, i32) {
    %c0_i32 = arith.constant 0 : i32
    %c0_i32_0 = arith.constant 0 : i32
    %c0_i32_1 = arith.constant 0 : i32
    return %arg0, %c0_i32, %arg1, %c0_i32_0 : i32, i32, i32, i32
  }
  func.func @transform_7(%arg0: i32, %arg1: i32) -> (i32, i32, i32, i32) {
    %c0_i32 = arith.constant 0 : i32
    %c0_i32_0 = arith.constant 0 : i32
    %c0_i32_1 = arith.constant 0 : i32
    return %arg0, %c0_i32, %arg1, %c0_i32_0 : i32, i32, i32, i32
  }
}

</mosaic_0001>

<bundles_post_ra>
// kernel: tpu_custom_call.1
= control target key start
LH: loop header
LB: loop body
LE: loop exit
PB: predicated region body
PF: predicated region fallthrough
CT: control target
= control target key end

     0   :  { %s2869_s0 = inlined_call_operand.hbm [shape: f32[2,128,32], index: 0, kind: input, shape index: {}]   ;;  %s2870_s1 = inlined_call_operand.hbm [shape: f32[1,32], index: 1, kind: input, shape index: {}]   ;;  %s2871_s2 = inlined_call_operand.hbm [shape: f32[1,32], index: 2, kind: input, shape index: {}]   ;;  %s2872_s3 = inlined_call_operand.hbm [shape: bf16[32,96], index: 3, kind: input, shape index: {}]   ;;  %s2873_s4 = inlined_call_operand.hbm [shape: f32[1,96], index: 4, kind: input, shape index: {}]   ;;  %s2874_s5 = inlined_call_operand.hbm [shape: bf16[2,4,128,8], index: 5, kind: output, shape index: {0}]   ;;  %s2875_s6 = inlined_call_operand.hbm [shape: bf16[2,4,128,8], index: 6, kind: output, shape index: {1}]   ;;  %s2876_s7 = inlined_call_operand.hbm [shape: bf16[2,4,128,8], index: 7, kind: output, shape index: {2}]  }
   0x1   :  { %2884 = sst [smem:[#allocation29_spill]] %s2870_s1 }
   0x2   :  { %2885 = sst [smem:[#allocation30_spill]] %s2871_s2 }
   0x3   :  { %2886 = sst [smem:[#allocation31_spill]] %s2872_s3 }
   0x4   :  { %2887 = sst [smem:[#allocation32_spill]] %s2873_s4 }
   0x5   :  { %2888 = sst [smem:[#allocation33_spill]] %s2875_s6 }
   0x6   :  { %2889 = sst [smem:[#allocation34_spill]] %s2876_s7 }
   0x7   :  { %13 = vsyncpa [#allocation3], 0 }
   0x8   :  { %15 = vsyncpa [#allocation3 + $0x1], 0 }
   0x9   :  { %16 = vsyncpa [#allocation6], 0 }
   0xa   :  { %17 = vsyncpa [#allocation9], 0 }
   0xb   :  { %18 = vsyncpa [#allocation4], 0 }
   0xc   :  { %20 = vsyncpa [#allocation4 + $0x1], 0 }
   0xd   :  { %21 = vsyncpa [#allocation13], 0 }
   0xe   :  { %23 = vsyncpa [#allocation13 + $0x1], 0  ;;  %s2050_s24 = smov 0   ;;  %s2052_s25 = smov 0  }
   0xf   :  { %s2054_s26 = smov 0   ;;  %s2056_s27 = smov 0  }
  0x10   :  { %s2058_s28 = smov 0   ;;  %s2060_s29 = smov 0  }
  0x11   :  { %s2062_s30 = smov 0   ;;  %s2064_s8 = smov 0  }
  0x12 LB: > { %2890 = sst [smem:[#allocation26_spill]] %s1939_s24  ;;  %s2091_s9 = sadd.s32 4294967295, %s1967_s8   ;;  %s1967_s8 = sphi %s2064_s8, %s29_s8   ;;  %s1963_s30 = sphi %s2062_s30, %s2925_s30   ;;  %s1959_s29 = sphi %s2060_s29, %s2924_s29   ;;  %s1955_s28 = sphi %s2058_s28, %s2923_s28   ;;  %s1951_s27 = sphi %s2056_s27, %s2922_s27   ;;  %s1947_s26 = sphi %s2054_s26, %s2921_s26   ;;  %s1943_s25 = sphi %s2052_s25, %s2920_s25   ;;  %s1939_s24 = sphi %s2050_s24, %s2919_s24  }
  0x13   : > { %s2877_s10 = sadd.s32 4294967294, %s1967_s8   ;;  %p63_p0 = scmp.ne.s32.totalorder %s1943_s25, %s1939_s24 }
  0x14   : > { %p2879_p1 = scmp.eq.s32.totalorder %s2091_s9, 0  ;;  %p179_p3 = scmp.eq.s32.totalorder %s2877_s10, 3 }
  0x15   : > { %p1390_p5 = scmp.ge.s32.totalorder %s1967_s8, 1  ;;  %p242_p7 = scmp.lt.s32.totalorder %s1967_s8, 5 }
  0x16   : > { %p2102_p4 = por %p2879_p1, %p63_p0  ;;  %p2107_p6 = por %p179_p3, %p63_p0 }
  0x17   : > { %p2112_p8 = pnand %p1390_p5, %p242_p7  ;;  %s1969_s14 = smov [#allocation5]  }
  0x18   : > { %s2891_s11 = scalar_select %p2102_p4, 1, 0 }
  0x19   : > { %s2892_s12 = scalar_select %p2107_p6, 1, 0 }
  0x1a   : > { %s2894_s13 = scalar_select %p2112_p8, 1, 0 }
  0x1b   : > { %2893 = sst [smem:[#allocation27_spill]] %s2892_s12  ;;  %s255_s15 = sshll.u32 %s1969_s14, 4  ;;  %s256_s15 = int_to_ptr.vmem [resolvable:$true] %s255_s15 }
  0x1c   : > { %p1584_p9 = pneg %p2112_p8  ;;  %s1970_s16 = smov [#allocation8]  }
  0x1d   : > { %s276_s17 = sshll.u32 %s1970_s16, 4  ;;  %s1971_s19 = smov [#allocation7]   ;;  %s2124_s17 = int_to_ptr.vmem [resolvable:$true] %s276_s17 }
  0x1e   : > { %p2120_p10 = pnand %p1584_p9, %p2879_p1  ;;  %s2126_s20 = sshll.u32 %s1971_s19, 4  ;;  %s267_s20 = int_to_ptr.vmem [resolvable:$true] %s2126_s20 }
  0x1f   : > { %s2896_s1 = sld [smem:[#allocation29_spill]] }
  0x20   : > { %p2136_p12 = pneg %p2120_p10 }
  0x25   : > { %s1743_s23 = scalar_lea.hbm %s2896_s1, 16 }
  0x26   : > { %p1744_p11 = scmp.ne.s32.totalorder %s2896_s1, %s1743_s23  ;;  %p1750_p3 = scmp.lt.u32.totalorder %s1743_s23, %s2896_s1 }
  0x28   : > { %p1746_p13 = pnand %p2136_p12, %p1744_p11 }
  0x2a   : > { %p1747_p0 = pneg %p1746_p13 }
  0x2c   : > { %p1752_p5 = pnand %p1750_p3, %p1747_p0 }
  0x2e   : > { %1755 = shalt.err (!%p1752_p5)
}
  0x2f   : > { %s1756_s21 = scalar_lea.vmem %s256_s15, 16  ;;  %s1763_s10 = scalar_lea.vmem %s256_s15, 32 }
  0x30   : > { %p1757_p7 = scmp.ne.s32.totalorder %s256_s15, %s1756_s21  ;;  %p1764_p2 = scmp.lt.s32.totalorder %s256_s15, %s256_s15 }
  0x31   : > { %p1765_p6 = scmp.lt.s32.totalorder %s1763_s10, %s1756_s21 }
  0x32   : > { %p1759_p9 = pnand %p1757_p7, %p2136_p12 }
  0x33   : > { %p1766_p4 = por %p1765_p6, %p1764_p2 }
  0x34   : > { %p1760_p1 = pneg %p1759_p9 }
  0x36   : > { %p1767_p8 = pnand %p1766_p4, %p1760_p1 }
  0x38   : > { %1770 = shalt.err (!%p1767_p8)
}
  0x39   : > { %1587 = dma.hbm_to_vmem [thread:$0]  (!%p2120_p10), %s2896_s1, 16, %s256_s15, [#allocation6]  }
  0x3a   : > { %s2898_s3 = sld [smem:[#allocation31_spill]] }
  0x40   : > { %s1771_s19 = scalar_lea.hbm %s2898_s3, 256 }
  0x41   : > { %p1772_p11 = scmp.ne.s32.totalorder %s2898_s3, %s1771_s19  ;;  %p1778_p1 = scmp.lt.u32.totalorder %s1771_s19, %s2898_s3 }
  0x43   : > { %p1774_p13 = pnand %p1772_p11, %p2136_p12 }
  0x45   : > { %p1775_p2 = pneg %p1774_p13 }
  0x47   : > { %p1780_p4 = pnand %p1778_p1, %p1775_p2 }
  0x49   : > { %1783 = shalt.err (!%p1780_p4)
}
  0x4a   : > { %s1784_s15 = scalar_lea.vmem %s2124_s17, 256  ;;  %p1792_p3 = scmp.lt.s32.totalorder %s2124_s17, %s2124_s17 }
  0x4b   : > { %p1785_p6 = scmp.ne.s32.totalorder %s2124_s17, %s1784_s15  ;;  %p1793_p5 = scmp.lt.s32.totalorder %s1784_s15, %s1784_s15 }
  0x4d   : > { %p1787_p8 = pnand %p1785_p6, %p2136_p12  ;;  %p1794_p7 = por %p1793_p5, %p1792_p3 }
  0x4f   : > { %p1788_p0 = pneg %p1787_p8 }
  0x51   : > { %p1795_p9 = pnand %p1794_p7, %p1788_p0 }
  0x53   : > { %1798 = shalt.err (!%p1795_p9)
}
  0x54   : > { %s1972_s7 = smov 64   ;;  %s1973_s24 = smov 4  }
  0x55   : > { %1593 = dma.hbm_to_vmem [thread:$0]  (!%p2120_p10), %s2898_s3, 256, %s2124_s17, [#allocation9], %s1972_s7, %s1972_s7, %s1973_s24  }
  0x56   : > { %s2899_s2 = sld [smem:[#allocation30_spill]] }
  0x5c   : > { %s1799_s19 = scalar_lea.hbm %s2899_s2, 16 }
  0x5d   : > { %p1800_p11 = scmp.ne.s32.totalorder %s2899_s2, %s1799_s19  ;;  %p1806_p1 = scmp.lt.u32.totalorder %s1799_s19, %s2899_s2 }
  0x5f   : > { %p1802_p13 = pnand %p1800_p11, %p2136_p12 }
  0x61   : > { %p1803_p2 = pneg %p1802_p13 }
  0x63   : > { %p1808_p4 = pnand %p1806_p1, %p1803_p2 }
  0x65   : > { %1811 = shalt.err (!%p1808_p4)
}
  0x66   : > { %s1812_s22 = scalar_lea.vmem %s267_s20, 16  ;;  %s1819_s17 = scalar_lea.vmem %s267_s20, 32 }
  0x67   : > { %p1813_p6 = scmp.ne.s32.totalorder %s267_s20, %s1812_s22  ;;  %p1820_p3 = scmp.lt.s32.totalorder %s267_s20, %s267_s20 }
  0x68   : > { %p1821_p5 = scmp.lt.s32.totalorder %s1819_s17, %s1812_s22 }
  0x69   : > { %p1815_p8 = pnand %p1813_p6, %p2136_p12 }
  0x6a   : > { %p1822_p7 = por %p1821_p5, %p1820_p3 }
  0x6b   : > { %p1816_p0 = pneg %p1815_p8 }
  0x6d   : > { %p1823_p9 = pnand %p1822_p7, %p1816_p0 }
  0x6f   : > { %1826 = shalt.err (!%p1823_p9)
}
  0x70   : > { %1590 = dma.hbm_to_vmem [thread:$0]  (!%p2120_p10), %s2899_s2, 16, %s267_s20, [#allocation6]  }
  0x71   : > { %s1974_s1 = smov [#allocation10]   ;;  %s2900_s4 = sld [smem:[#allocation32_spill]] }
  0x72   : > { %s290_s14 = sshll.u32 %s1974_s1, 4  ;;  %s291_s14 = int_to_ptr.vmem [resolvable:$true] %s290_s14 }
  0x77   : > { %s1827_s19 = scalar_lea.hbm %s2900_s4, 16 }
  0x78   : > { %p1828_p11 = scmp.ne.s32.totalorder %s2900_s4, %s1827_s19  ;;  %p1834_p1 = scmp.lt.u32.totalorder %s1827_s19, %s2900_s4 }
  0x7a   : > { %p1830_p13 = pnand %p1828_p11, %p2136_p12 }
  0x7c   : > { %p1831_p2 = pneg %p1830_p13 }
  0x7e   : > { %p1836_p4 = pnand %p1834_p1, %p1831_p2 }
  0x80   : > { %1839 = shalt.err (!%p1836_p4)
}
  0x81   : > { %s1840_s20 = scalar_lea.vmem %s291_s14, 16  ;;  %s1847_s17 = scalar_lea.vmem %s291_s14, 32 }
  0x82   : > { %p1841_p6 = scmp.ne.s32.totalorder %s291_s14, %s1840_s20  ;;  %p1848_p3 = scmp.lt.s32.totalorder %s291_s14, %s291_s14 }
  0x83   : > { %p1849_p5 = scmp.lt.s32.totalorder %s1847_s17, %s1840_s20 }
  0x84   : > { %p1843_p8 = pnand %p1841_p6, %p2136_p12 }
  0x85   : > { %p1850_p7 = por %p1849_p5, %p1848_p3 }
  0x86   : > { %p1844_p0 = pneg %p1843_p8 }
  0x88   : > { %p1851_p9 = pnand %p1850_p7, %p1844_p0 }
  0x8a   : > { %1854 = shalt.err (!%p1851_p9)
}
  0x8b   : > { %1596 = dma.hbm_to_vmem [thread:$0]  (!%p2120_p10), %s2900_s4, 16, %s291_s14, [#allocation9]  }
  0x8c   : > { %s38_s16 = sadd.s32 1, %s1959_s29  ;;  %s41_s1 = sadd.s32 1, %s1963_s30 }
  0x8d   : > { %p39_p12 = scmp.ge.s32.totalorder %s38_s16, 2  ;;  %s50_s18 = sadd.s32 1, %s1947_s26 }
  0x8e   : > { %p57_p11 = scmp.ne.s32.totalorder %s1947_s26, %s1943_s25  ;;  %p58_p13 = scmp.eq.s32.totalorder %s1967_s8, 0 }
  0x8f   : > { %s2927_s16 = smov (%p39_p12, %s38_s16), 0  ;;  %s2929_s1 = smov (!%p39_p12, %s41_s1), %s1963_s30 }
  0x90   : > { %2901 = sst [smem:[#allocation28_spill]] %s2927_s16  ;;  %s46_s12 = ssub.s32 %s1959_s29, %s2927_s16 }
  0x91   : > { %p2223_p2 = por %p58_p13, %p57_p11  ;;  %p43_p10 = scmp.ge.s32.totalorder %s2929_s1, 2 }
  0x92   : > { %p2903_p1 = scmp.eq.s32.totalorder %s2091_s9, 3  ;;  %p1615_p6 = scmp.lt.s32.totalorder %s1967_s8, 4 }
  0x93   : > { %s301_s19 = sand.u32 1, %s1947_s26   ;;  %s2931_s1 = smov (%p43_p10, %s2929_s1), 0 }
  0x94   : > { %p2229_p4 = por %p2903_p1, %p57_p11  ;;  %s1396_s21 = sshll.u32 %s301_s19, 6 }
  0x95   : > { %s45_s10 = ssub.s32 %s1963_s30, %s2931_s1  ;;  %s1397_s22 = sshll.u32 %s1959_s29, 3 }
  0x96   : > { %s47_s15 = sor.u32 %s46_s12, %s45_s10  ;;  %s1398_s20 = sshll.u32 %s1963_s30, 4 }
  0x97   : > { %p48_p8 = scmp.eq.s32.totalorder %s47_s15, 0  ;;  %s311_s17 = sadd.s32 %s1398_s20, %s1397_s22 }
  0x98   : > { %s305_s7 = scalar_lea.vmem [#allocation2], %s1396_s21  ;;  %s1399_s3 = sshll.u32 %s311_s17, 7 }
  0x99   : > { %s314_s24 = sshll.u32 %s305_s7, 4  ;;  %s2249_s6 = scalar_lea.hbm %s2869_s0, %s1399_s3  ;;  %s2244_s24 = int_to_ptr.vmem [resolvable:$true] %s314_s24 }
  0x9a   : > { %s2242_s2 = scalar_select %p48_p8, %s1947_s26, %s50_s18  }
  0x9b   : > { %p2255_p0 = pnand %p1615_p6, %p2223_p2  ;;  %s2259_s18 = scalar_lea.sflag [#allocation3], %s301_s19 }
  0x9c   : > { %s1855_s21 = scalar_lea.hbm %s2249_s6, 1024  ;;  %s1860_s16 = scalar_lea.hbm %s2869_s0, 4096 }
  0x9d   : > { %p1856_p3 = scmp.ne.s32.totalorder %s2249_s6, %s1855_s21  ;;  %p1857_p5 = pneg %p2255_p0 }
  0x9e   : > { %p1861_p12 = scmp.lt.u32.totalorder %s2249_s6, %s2869_s0  ;;  %p1862_p11 = scmp.lt.u32.totalorder %s1860_s16, %s1855_s21 }
  0x9f   : > { %p1858_p7 = pnand %p1857_p5, %p1856_p3  ;;  %p1864_p2 = scmp.lt.u32.totalorder %s1855_s21, %s2249_s6 }
  0xa0   : > { %p1863_p13 = por %p1862_p11, %p1861_p12 }
  0xa1   : > { %p1859_p9 = pneg %p1858_p7 }
  0xa2   : > { %p1865_p10 = por %p1864_p2, %p1863_p13 }
  0xa4   : > { %p1866_p1 = pnand %p1865_p10, %p1859_p9 }
  0xa6   : > { %1869 = shalt.err (!%p1866_p1)
}
  0xa7   : > { %s1870_s19 = scalar_lea.vmem %s2244_s24, 1024  ;;  %s1975_s15 = smov [#allocation2]  }
  0xa8   : > { %p1871_p6 = scmp.ne.s32.totalorder %s2244_s24, %s1870_s19  ;;  %s1875_s22 = sshll.u32 %s1975_s15, 4  ;;  %s1876_s22 = int_to_ptr.vmem [resolvable:$false] %s1875_s22 }
  0xa9   : > { %s1877_s20 = scalar_lea.vmem %s1876_s22, 2048  ;;  %p1878_p7 = scmp.lt.s32.totalorder %s2244_s24, %s1876_s22 }
  0xaa   : > { %p1873_p8 = pnand %p1871_p6, %p1857_p5  ;;  %p1879_p12 = scmp.lt.s32.totalorder %s1877_s20, %s1870_s19 }
  0xac   : > { %p1874_p3 = pneg %p1873_p8  ;;  %p1880_p11 = por %p1879_p12, %p1878_p7 }
  0xae   : > { %p1881_p13 = pnand %p1880_p11, %p1874_p3 }
  0xb0   : > { %1884 = shalt.err (!%p1881_p13)
}
  0xb1   : > { %s1976_s17 = smov 128   ;;  %s1977_s7 = smov 8  }
  0xb2   : > { %1600 = dma.hbm_to_vmem [thread:$0]  (!%p2255_p0), %s2249_s6, 1024, %s2244_s24, %s2259_s18, %s1976_s17, %s1976_s17, %s1977_s7  }
  0xb3   : > { %p2906_p5 = scmp.ne.s32.totalorder %s2894_s13, 0 }
  0xb4   : > { %s2290_s21 = sand.u32 (!%p2906_p5), 1, %s1943_s25   ;;  %p2907_p9 = scmp.ne.s32.totalorder (!%p2906_p5), %s2891_s11, 0 }
  0xb5   : > { %326 = sbr.rel (%p2906_p5) target bundleno = 1061 (0x425), region = 40  ;;  %s1401_s3 = sshll.u32 (!%p2906_p5), %s2290_s21, 6 }
  0xb6   : > { %s329_s4 = scalar_lea.sflag (!%p2906_p5), [#allocation3], %s2290_s21  ;;  %s332_s16 = scalar_lea.vmem (!%p2906_p5), [#allocation2], %s1401_s3 }
  0xbc   : > { %1918 = dma.done.wait (%p2907_p9), %s329_s4, 1024  }
  0xbd   : > { %1920 = vsyncadd (%p2907_p9), %s329_s4, 4294966272  ;;  %p2908_p2 = scmp.eq.s32.totalorder %s2091_s9, 0 }
  0xbf   : > { %1922 = dma.done.wait (%p2908_p2), [#allocation6], 32   ;;  %p2909_p0 = pmov %p2908_p2 }
  0xc1   : > { %1924 = vsyncadd (%p2909_p0), [#allocation6], 4294967264  ;;  %p2910_p10 = pmov %p2909_p0 }
  0xc2   : > { %p2911_p1 = pmov %p2909_p0 }
  0xc3   : > { %1926 = dma.done.wait (%p2910_p10), [#allocation9], 272  }
  0xc4   : > { %1928 = vsyncadd (%p2911_p1), [#allocation9], 4294967024  ;;  %vm404_vm0 = vcmask 261120   ;;  %v394_v0 = vld [vmem:[%s332_s16] sm:$0xff]  ;;  %v395_v2 = vld [vmem:[%s332_s16 + $0x8] sm:$0xff]  ;;  %s2367_s6 = sshll.u32 %s2290_s21, 7 }
  0xc5   : > { %v398_v1 = vld [vmem:[%s332_s16 + $0x20] sm:$0xff]  ;;  %v405_v3 = vsel %vm404_vm0, %v394_v0, 0.0  ;;  %v399_v5 = vld [vmem:[%s332_s16 + $0x28] sm:$0xff]  ;;  %v408_v6 = vsel %vm404_vm0, %v395_v2, 0.0  ;;  %v396_v8 = vld [vmem:[%s332_s16 + $0x10] sm:$0xff]  ;;  %vm674_vm1 = vcmask 60416  }
  0xc6   : > { %v417_v4 = vsel %vm404_vm0, %v398_v1, 0.0  ;;  %406 = vadd.xlane.f32.xlu0 %v405_v3  ;;  %v420_v7 = vsel %vm404_vm0, %v399_v5, 0.0  ;;  %v397_v9 = vld [vmem:[%s332_s16 + $0x18] sm:$0xff]  ;;  %v411_v10 = vsel %vm404_vm0, %v396_v8, 0.0  ;;  %v400_v12 = vld [vmem:[%s332_s16 + $0x30] sm:$0xff]  ;;  %v1725_v56 = vld [vmem:[#allocation8] sm:$0xff]  }
  0xc7   : > { %418 = vadd.xlane.f32.xlu1 %v417_v4  ;;  %v414_v11 = vsel %vm404_vm0, %v397_v9, 0.0  ;;  %v401_v13 = vld [vmem:[%s332_s16 + $0x38] sm:$0xff]  ;;  %v423_v14 = vsel %vm404_vm0, %v400_v12, 0.0  ;;  %1526 = vmatprep.subr.bf16.mxu0 %v1725_v56  ;;  %v1726_v57 = vld [vmem:[#allocation8 + $0x8] sm:$0xff]   ;;  %s2374_s11 = scalar_lea.vmem [#allocation11], %s2367_s6  ;;  %s1978_s13 = smov 96  }
  0xc8   : > { %v426_v15 = vsel %vm404_vm0, %v401_v13, 0.0  ;;  %1538 = vmatprep.subr.bf16.mxu1 %v1725_v56  ;;  %1527 = vmatpush3.bf16.msra.mxu0 %v1725_v56  ;;  %s1979_s24 = smov 64   ;;  %s1980_s12 = smov 120  }
  0xc9   : > { %1540 = vmatpush3.bf16.msra.mxu1 %v1725_v56  ;;  %1528 = vmatprep.subr.bf16.mxu0 %v1726_v57  ;;  %s1981_s18 = smov 88   ;;  %s1982_s23 = smov 56  }
  0xca   : > { %409 = vadd.xlane.f32.xlu0 %v408_v6  ;;  %1539 = vmatprep.subr.bf16.mxu1 %v1726_v57  ;;  %s1983_s10 = smov 112   ;;  %s1984_s19 = smov 80  }
  0xcb   : > { %421 = vadd.xlane.f32.xlu1 %v420_v7  ;;  %s1985_s15 = smov 48   ;;  %s1986_s22 = smov 104  }
  0xcc   : > { %1529 = vmatpush3.bf16.msra.mxu0 %v1726_v57  ;;  %s1987_s20 = smov 72   ;;  %s1988_s17 = smov 40  }
  0xcd   : > { %1541 = vmatpush3.bf16.msra.mxu1 %v1726_v57  ;;  %s2527_s7 = scalar_lea.vmem [#allocation12], %s2367_s6  ;;  %s2544_s3 = scalar_lea.vmem [#allocation14], %s2367_s6 }
  0xce   : > { %412 = vadd.xlane.f32.xlu0 %v411_v10  ;;  %s1049_s4 = sand.u32 1, %s2091_s9   ;;  %s1045_s16 = scalar_lea.sflag [#allocation4], %s2290_s21 }
  0xcf   : > { %415 = vadd.xlane.f32.xlu1 %v414_v11  ;;  %s2774_s6 = scalar_lea.sflag [#allocation13], %s1049_s4 }
  0xd2   : > { %424 = vadd.xlane.f32.xlu0 %v423_v14 }
  0xd3   : > { %427 = vadd.xlane.f32.xlu1 %v426_v15 }
 0x153   : > { %v407_v16 = vpop.xlane.xlu0 %406 }
 0x154   : > { %v419_v17 = vpop.xlane.xlu1 %418  ;;  %v430_v18 = vmul.f32 0.03125, %v407_v16 }
 0x155   : > { %v434_v19 = vmul.f32 0.03125, %v419_v17 }
 0x156   : > { %v2314_v20 = vsub.f32 %v394_v0, %v430_v18 }
 0x157   : > { %v2316_v21 = vsub.f32 %v398_v1, %v434_v19  ;;  %v410_v22 = vpop.xlane.xlu0 %409  ;;  %v1409_v19 = vld [vmem:[#allocation5] ss:$0 sm:$0xff] }
 0x158   : > { %v422_v23 = vpop.xlane.xlu1 %421  ;;  %v431_v24 = vmul.f32 0.03125, %v410_v22  ;;  %v446_v26 = vmul.f32 %v2314_v20, %v2314_v20 }
 0x159   : > { %v435_v25 = vmul.f32 0.03125, %v422_v23  ;;  %v450_v27 = vmul.f32 %v2316_v21, %v2316_v21 }
 0x15a   : > { %v2322_v28 = vsub.f32 %v395_v2, %v431_v24  ;;  %v454_v30 = vsel %vm404_vm0, %v446_v26, 0.0 }
 0x15b   : > { %v2324_v29 = vsub.f32 %v399_v5, %v435_v25  ;;  %455 = vadd.xlane.f32.xlu0 %v454_v30  ;;  %v413_v31 = vpop.xlane.xlu0 %412  ;;  %v466_v33 = vsel %vm404_vm0, %v450_v27, 0.0  ;;  %v1410_v27 = vld [vmem:[#allocation7] ss:$0 sm:$0xff] }
 0x15c   : > { %v416_v32 = vpop.xlane.xlu1 %415  ;;  %v432_v34 = vmul.f32 0.03125, %v413_v31  ;;  %v447_v36 = vmul.f32 %v2322_v28, %v2322_v28 }
 0x15d   : > { %v433_v35 = vmul.f32 0.03125, %v416_v32  ;;  %v451_v37 = vmul.f32 %v2324_v29, %v2324_v29 }
 0x15e   : > { %v2332_v38 = vsub.f32 %v396_v8, %v432_v34  ;;  %v457_v40 = vsel %vm404_vm0, %v447_v36, 0.0 }
 0x15f   : > { %v2334_v39 = vsub.f32 %v397_v9, %v433_v35  ;;  %467 = vadd.xlane.f32.xlu0 %v466_v33  ;;  %458 = vadd.xlane.f32.xlu1 %v457_v40  ;;  %v425_v41 = vpop.xlane.xlu0 %424  ;;  %v469_v43 = vsel %vm404_vm0, %v451_v37, 0.0 }
 0x160   : > { %v428_v42 = vpop.xlane.xlu1 %427  ;;  %v436_v44 = vmul.f32 0.03125, %v425_v41  ;;  %v448_v46 = vmul.f32 %v2332_v38, %v2332_v38 }
 0x161   : > { %v437_v45 = vmul.f32 0.03125, %v428_v42  ;;  %v449_v47 = vmul.f32 %v2334_v39, %v2334_v39 }
 0x162   : > { %v2342_v48 = vsub.f32 %v400_v12, %v436_v44  ;;  %v460_v50 = vsel %vm404_vm0, %v448_v46, 0.0 }
 0x163   : > { %v2344_v49 = vsub.f32 %v401_v13, %v437_v45  ;;  %470 = vadd.xlane.f32.xlu1 %v469_v43  ;;  %461 = vadd.xlane.f32.xlu0 %v460_v50  ;;  %v463_v51 = vsel %vm404_vm0, %v449_v47, 0.0 }
 0x164   : > { %v452_v52 = vmul.f32 %v2342_v48, %v2342_v48 }
 0x165   : > { %v453_v53 = vmul.f32 %v2344_v49, %v2344_v49 }
 0x166   : > { %v472_v54 = vsel %vm404_vm0, %v452_v52, 0.0 }
 0x167   : > { %464 = vadd.xlane.f32.xlu1 %v463_v51  ;;  %473 = vadd.xlane.f32.xlu0 %v472_v54  ;;  %v475_v55 = vsel %vm404_vm0, %v453_v53, 0.0 }
 0x16b   : > { %476 = vadd.xlane.f32.xlu1 %v475_v55 }
 0x1e8   : > { %v456_v58 = vpop.xlane.xlu0 %455 }
 0x1e9   : > { %v478_v59 = vmul.f32 0.03125, %v456_v58 }
 0x1eb   : > { %v486_v60 = vadd.f32 1e-05, %v478_v59 }
 0x1ec   : > { %v459_v61 = vpop.xlane.xlu1 %458  ;;  %v468_v62 = vpop.xlane.xlu0 %467 }
 0x1ed   : > { %1727 = vrsqrt.f32 %v486_v60  ;;  %v479_v63 = vmul.f32 0.03125, %v459_v61  ;;  %v482_v0 = vmul.f32 0.03125, %v468_v62 }
 0x1ef   : > { %v487_v1 = vadd.f32 1e-05, %v479_v63  ;;  %v490_v2 = vadd.f32 1e-05, %v482_v0 }
 0x1f0   : > { %v471_v3 = vpop.xlane.xlu1 %470  ;;  %v462_v4 = vpop.xlane.xlu0 %461 }
 0x1f1   : > { %1729 = vrsqrt.f32 %v487_v1  ;;  %v483_v5 = vmul.f32 0.03125, %v471_v3  ;;  %v480_v6 = vmul.f32 0.03125, %v462_v4 }
 0x1f2   : > { %1731 = vrsqrt.f32 %v490_v2 }
 0x1f3   : > { %v491_v7 = vadd.f32 1e-05, %v483_v5  ;;  %v488_v8 = vadd.f32 1e-05, %v480_v6 }
 0x1f4   : > { %v465_v9 = vpop.xlane.xlu1 %464  ;;  %v474_v10 = vpop.xlane.xlu0 %473 }
 0x1f5   : > { %1733 = vrsqrt.f32 %v491_v7  ;;  %v481_v11 = vmul.f32 0.03125, %v465_v9  ;;  %v484_v12 = vmul.f32 0.03125, %v474_v10 }
 0x1f6   : > { %1735 = vrsqrt.f32 %v488_v8 }
 0x1f7   : > { %v1728_v13 = vpop.eup %1727  ;;  %v489_v14 = vadd.f32 1e-05, %v481_v11  ;;  %v492_v15 = vadd.f32 1e-05, %v484_v12 }
 0x1f8   : > { %v477_v16 = vpop.xlane.xlu1 %476  ;;  %v502_v17 = vmul.f32 %v1728_v13, %v2314_v20 }
 0x1f9   : > { %1737 = vrsqrt.f32 %v489_v14  ;;  %v485_v18 = vmul.f32 0.03125, %v477_v16 }
 0x1fa   : > { %1739 = vrsqrt.f32 %v492_v15  ;;  %v516_v26 = vmul.f32 %v1409_v19, %v502_v17 }
 0x1fb   : > { %v1730_v22 = vpop.eup %1729  ;;  %v493_v23 = vadd.f32 1e-05, %v485_v18 }
 0x1fc   : > { %v1732_v24 = vpop.eup %1731  ;;  %v503_v25 = vmul.f32 %v1730_v22, %v2322_v28  ;;  %v530_v34 = vadd.f32 %v1410_v27, %v516_v26 }
 0x1fd   : > { %1741 = vrsqrt.f32 %v493_v23  ;;  %v506_v30 = vmul.f32 %v1732_v24, %v2316_v21 }
 0x1fe   : > { %v517_v31 = vmul.f32 %v1409_v19, %v503_v25 }
 0x1ff   : > { %v1734_v32 = vpop.eup %1733  ;;  %v520_v36 = vmul.f32 %v1409_v19, %v506_v30 }
 0x200   : > { %v1736_v33 = vpop.eup %1735  ;;  %v531_v35 = vadd.f32 %v1410_v27, %v517_v31  ;;  %v507_v20 = vmul.f32 %v1734_v32, %v2324_v29 }
 0x201   : > { %v504_v37 = vmul.f32 %v1736_v33, %v2332_v38  ;;  %v534_v44 = vadd.f32 %v1410_v27, %v520_v36 }
 0x202   : > { %v538_v40 = vpack.c.bf16 %v531_v35, %v530_v34  ;;  %v521_v41 = vmul.f32 %v1409_v19, %v507_v20 }
 0x203   : > { %v1738_v42 = vpop.eup %1737  ;;  %v518_v45 = vmul.f32 %v1409_v19, %v504_v37 }
 0x204   : > { %v1740_v43 = vpop.eup %1739  ;;  %v505_v28 = vmul.f32 %v1738_v42, %v2334_v39  ;;  %1530 = vmatprep.mubr.msk.bf16.mxu0 %vm404_vm0, %v538_v40  ;;  %v535_v21 = vadd.f32 %v1410_v27, %v521_v41 }
 0x205   : > { %v508_v46 = vmul.f32 %v1740_v43, %v2342_v48  ;;  %v532_v38 = vadd.f32 %v1410_v27, %v518_v45  ;;  %v1411_v48 = vld [vmem:[#allocation10] ss:$0 sm:$0xff] }
 0x206   : > { %v540_v47 = vpack.c.bf16 %v535_v21, %v534_v44  ;;  %v519_v50 = vmul.f32 %v1409_v19, %v505_v28 }
 0x207   : > { %v1742_v29 = vpop.eup %1741  ;;  %v522_v53 = vmul.f32 %v1409_v19, %v508_v46 }
 0x208   : > { %v509_v51 = vmul.f32 %v1742_v29, %v2344_v49  ;;  %1534 = vmatprep.mubr.msk.bf16.mxu1 %vm404_vm0, %v540_v47  ;;  %v533_v52 = vadd.f32 %v1410_v27, %v519_v50 }
 0x209   : > { %v536_v55 = vadd.f32 %v1410_v27, %v522_v53 }
 0x20a   : > { %v539_v54 = vpack.c.bf16 %v533_v52, %v532_v38  ;;  %v523_v39 = vmul.f32 %v1409_v19, %v509_v51 }
 0x20c   : > { %1531 = vmatmul.mubr.msk.bf16.vlgmr.msra.gmra.mrb[0].mxu0 %vm404_vm0, %v539_v54  ;;  %v537_v56 = vadd.f32 %v1410_v27, %v523_v39 }
 0x20e   : > { %v541_v57 = vpack.c.bf16 %v537_v56, %v536_v55 }
 0x210   : > { %1535 = vmatmul.mubr.msk.bf16.vlgmr.msra.gmra.mrb[0].mxu1 %vm404_vm0, %v541_v57 }
 0x2df   : > { %v1532_v58 = vpop.f32.mrb[0].mxu0 }
 0x2e0   : > { %v620_v49 = vadd.f32 %v1532_v58, %v1411_v48  ;;  %v611_v59 = vpop.f32.mrb[1].mxu0 }
 0x2e1   : > { %v612_v60 = vadd.f32 %v1411_v48, %v611_v59  ;;  %v1533_v61 = vpop.f32.mrb[2].mxu0 }
 0x2e2   : > { %v2369_v62 = vpack.c.bf16 %v620_v49, %v620_v49  ;;  %v623_v63 = vadd.f32 %v1533_v61, %v1411_v48  ;;  %v614_v0 = vpop.f32.mrb[3].mxu0 }
 0x2e3   : > { %v2371_v1 = vpack.c.bf16 %v612_v60, %v612_v60  ;;  %v615_v2 = vadd.f32 %v1411_v48, %v614_v0  ;;  %v1536_v3 = vpop.f32.mrb[0].mxu1 }
 0x2e4   : > { %677 = vst.msk [vmem:[%s2374_s11 + $0x8] sm:$0xf] %vm674_vm1, %v2369_v62  ;;  %v2379_v4 = vpack.c.bf16 %v623_v63, %v623_v63  ;;  %v636_v5 = vadd.f32 %v1536_v3, %v1411_v48  ;;  %687 = vrot.lane.b32.xlu1 %v2369_v62, %s1978_s13  ;;  %v627_v6 = vpop.f32.mrb[1].mxu1 }
 0x2e5   : > { %675 = vst.msk [vmem:[%s2374_s11] sm:$0xf] %vm674_vm1, %v2371_v1  ;;  %v2386_v7 = vpack.c.bf16 %v615_v2, %v615_v2  ;;  %v628_v8 = vadd.f32 %v1411_v48, %v627_v6  ;;  %v1537_v9 = vpop.f32.mrb[2].mxu1 }
 0x2e6   : > { %678 = vst.msk [vmem:[%s2374_s11 + $0xc] sm:$0xf] %vm674_vm1, %v2379_v4  ;;  %v2391_v10 = vpack.c.bf16 %v636_v5, %v636_v5  ;;  %v639_v11 = vadd.f32 %v1537_v9, %v1411_v48  ;;  %v630_v12 = vpop.f32.mrb[3].mxu1 }
 0x2e7   : > { %676 = vst.msk [vmem:[%s2374_s11 + $0x4] sm:$0xf] %vm674_vm1, %v2386_v7  ;;  %v2396_v13 = vpack.c.bf16 %v628_v8, %v628_v8  ;;  %v631_v14 = vadd.f32 %v1411_v48, %v630_v12 }
 0x2e8   : > { %681 = vst.msk [vmem:[%s2374_s11 + $0x18] sm:$0xf] %vm674_vm1, %v2391_v10  ;;  %v2401_v15 = vpack.c.bf16 %v639_v11, %v639_v11  ;;  %689 = vrot.lane.b32.xlu1 %v2379_v4, %s1978_s13  ;;  %695 = vrot.lane.b32.xlu0 %v2391_v10, %s1978_s13 }
 0x2e9   : > { %679 = vst.msk [vmem:[%s2374_s11 + $0x10] sm:$0xf] %vm674_vm1, %v2396_v13  ;;  %v2410_v16 = vpack.c.bf16 %v631_v14, %v631_v14 }
 0x2ea   : > { %682 = vst.msk [vmem:[%s2374_s11 + $0x1c] sm:$0xf] %vm674_vm1, %v2401_v15 }
 0x2eb   : > { %680 = vst.msk [vmem:[%s2374_s11 + $0x14] sm:$0xf] %vm674_vm1, %v2410_v16 }
 0x2ec   : > { %719 = vrot.lane.b32.xlu0 %v2369_v62, %s1979_s24  ;;  %697 = vrot.lane.b32.xlu1 %v2401_v15, %s1978_s13 }
 0x2f0   : > { %727 = vrot.lane.b32.xlu0 %v2391_v10, %s1979_s24  ;;  %721 = vrot.lane.b32.xlu1 %v2379_v4, %s1979_s24 }
 0x2f4   : > { %751 = vrot.lane.b32.xlu0 %v2369_v62, %s1980_s12  ;;  %729 = vrot.lane.b32.xlu1 %v2401_v15, %s1979_s24 }
 0x2f8   : > { %759 = vrot.lane.b32.xlu0 %v2391_v10, %s1980_s12  ;;  %753 = vrot.lane.b32.xlu1 %v2379_v4, %s1980_s12 }
 0x2fc   : > { %784 = vrot.lane.b32.xlu0 %v2369_v62, %s1981_s18  ;;  %761 = vrot.lane.b32.xlu1 %v2401_v15, %s1980_s12 }
 0x300   : > { %792 = vrot.lane.b32.xlu0 %v2391_v10, %s1981_s18  ;;  %786 = vrot.lane.b32.xlu1 %v2379_v4, %s1981_s18 }
 0x304   : > { %817 = vrot.lane.b32.xlu0 %v2369_v62, %s1982_s23  ;;  %794 = vrot.lane.b32.xlu1 %v2401_v15, %s1981_s18 }
 0x308   : > { %825 = vrot.lane.b32.xlu0 %v2391_v10, %s1982_s23  ;;  %819 = vrot.lane.b32.xlu1 %v2379_v4, %s1982_s23 }
 0x30c   : > { %850 = vrot.lane.b32.xlu0 %v2369_v62, %s1983_s10  ;;  %827 = vrot.lane.b32.xlu1 %v2401_v15, %s1982_s23 }
 0x310   : > { %858 = vrot.lane.b32.xlu0 %v2391_v10, %s1983_s10  ;;  %852 = vrot.lane.b32.xlu1 %v2379_v4, %s1983_s10 }
 0x314   : > { %883 = vrot.lane.b32.xlu0 %v2369_v62, %s1984_s19  ;;  %860 = vrot.lane.b32.xlu1 %v2401_v15, %s1983_s10 }
 0x318   : > { %891 = vrot.lane.b32.xlu0 %v2391_v10, %s1984_s19  ;;  %885 = vrot.lane.b32.xlu1 %v2379_v4, %s1984_s19 }
 0x31c   : > { %916 = vrot.lane.b32.xlu0 %v2369_v62, %s1985_s15  ;;  %893 = vrot.lane.b32.xlu1 %v2401_v15, %s1984_s19 }
 0x320   : > { %924 = vrot.lane.b32.xlu0 %v2391_v10, %s1985_s15  ;;  %918 = vrot.lane.b32.xlu1 %v2379_v4, %s1985_s15 }
 0x324   : > { %949 = vrot.lane.b32.xlu0 %v2369_v62, %s1986_s22  ;;  %926 = vrot.lane.b32.xlu1 %v2401_v15, %s1985_s15 }
 0x328   : > { %957 = vrot.lane.b32.xlu0 %v2391_v10, %s1986_s22  ;;  %951 = vrot.lane.b32.xlu1 %v2379_v4, %s1986_s22 }
 0x32c   : > { %982 = vrot.lane.b32.xlu0 %v2369_v62, %s1987_s20  ;;  %959 = vrot.lane.b32.xlu1 %v2401_v15, %s1986_s22 }
 0x330   : > { %990 = vrot.lane.b32.xlu0 %v2391_v10, %s1987_s20  ;;  %984 = vrot.lane.b32.xlu1 %v2379_v4, %s1987_s20 }
 0x334   : > { %1015 = vrot.lane.b32.xlu0 %v2369_v62, %s1988_s17  ;;  %992 = vrot.lane.b32.xlu1 %v2401_v15, %s1987_s20 }
 0x338   : > { %683 = vrot.lane.b32.xlu0 %v2371_v1, %s1978_s13  ;;  %1017 = vrot.lane.b32.xlu1 %v2379_v4, %s1988_s17 }
 0x33c   : > { %685 = vrot.lane.b32.xlu1 %v2386_v7, %s1978_s13  ;;  %691 = vrot.lane.b32.xlu0 %v2396_v13, %s1978_s13 }
 0x340   : > { %693 = vrot.lane.b32.xlu1 %v2410_v16, %s1978_s13  ;;  %715 = vrot.lane.b32.xlu0 %v2371_v1, %s1979_s24 }
 0x344   : > { %717 = vrot.lane.b32.xlu1 %v2386_v7, %s1979_s24  ;;  %723 = vrot.lane.b32.xlu0 %v2396_v13, %s1979_s24 }
 0x348   : > { %725 = vrot.lane.b32.xlu1 %v2410_v16, %s1979_s24  ;;  %747 = vrot.lane.b32.xlu0 %v2371_v1, %s1980_s12 }
 0x34c   : > { %749 = vrot.lane.b32.xlu1 %v2386_v7, %s1980_s12  ;;  %755 = vrot.lane.b32.xlu0 %v2396_v13, %s1980_s12 }
 0x350   : > { %757 = vrot.lane.b32.xlu1 %v2410_v16, %s1980_s12  ;;  %780 = vrot.lane.b32.xlu0 %v2371_v1, %s1981_s18 }
 0x354   : > { %782 = vrot.lane.b32.xlu1 %v2386_v7, %s1981_s18  ;;  %788 = vrot.lane.b32.xlu0 %v2396_v13, %s1981_s18 }
 0x356   : > { %v688_v17 = vpop.permute.xlu1 %687 }
 0x357   : > { %709 = vst.msk [vmem:[%s2527_s7 + $0x8] sm:$0xf] %vm674_vm1, %v688_v17 }
 0x358   : > { %790 = vrot.lane.b32.xlu1 %v2410_v16, %s1981_s18  ;;  %813 = vrot.lane.b32.xlu0 %v2371_v1, %s1982_s23 }
 0x35a   : > { %v690_v18 = vpop.permute.xlu1 %689  ;;  %v696_v19 = vpop.permute.xlu0 %695 }
 0x35b   : > { %710 = vst.msk [vmem:[%s2527_s7 + $0xc] sm:$0xf] %vm674_vm1, %v690_v18  ;;  %713 = vst.msk [vmem:[%s2527_s7 + $0x18] sm:$0xf] %vm674_vm1, %v696_v19 }
 0x35c   : > { %815 = vrot.lane.b32.xlu1 %v2386_v7, %s1982_s23  ;;  %821 = vrot.lane.b32.xlu0 %v2396_v13, %s1982_s23 }
 0x35e   : > { %v720_v22 = vpop.permute.xlu0 %719  ;;  %v698_v23 = vpop.permute.xlu1 %697 }
 0x35f   : > { %741 = vst.msk [vmem:[%s2544_s3 + $0x8] sm:$0xf] %vm674_vm1, %v720_v22  ;;  %714 = vst.msk [vmem:[%s2527_s7 + $0x1c] sm:$0xf] %vm674_vm1, %v698_v23 }
 0x360   : > { %823 = vrot.lane.b32.xlu1 %v2410_v16, %s1982_s23  ;;  %846 = vrot.lane.b32.xlu0 %v2371_v1, %s1983_s10 }
 0x362   : > { %v728_v24 = vpop.permute.xlu0 %727  ;;  %v722_v25 = vpop.permute.xlu1 %721 }
 0x363   : > { %745 = vst.msk [vmem:[%s2544_s3 + $0x18] sm:$0xf] %vm674_vm1, %v728_v24  ;;  %742 = vst.msk [vmem:[%s2544_s3 + $0xc] sm:$0xf] %vm674_vm1, %v722_v25 }
 0x364   : > { %848 = vrot.lane.b32.xlu1 %v2386_v7, %s1983_s10  ;;  %854 = vrot.lane.b32.xlu0 %v2396_v13, %s1983_s10 }
 0x366   : > { %v752_v26 = vpop.permute.xlu0 %751  ;;  %v730_v27 = vpop.permute.xlu1 %729 }
 0x367   : > { %1428 = vst.msk [vmem:[%s2374_s11 + $0x28] sm:$0xf] %vm674_vm1, %v752_v26  ;;  %746 = vst.msk [vmem:[%s2544_s3 + $0x1c] sm:$0xf] %vm674_vm1, %v730_v27 }
 0x368   : > { %856 = vrot.lane.b32.xlu1 %v2410_v16, %s1983_s10  ;;  %879 = vrot.lane.b32.xlu0 %v2371_v1, %s1984_s19 }
 0x36a   : > { %v760_v30 = vpop.permute.xlu0 %759  ;;  %v754_v31 = vpop.permute.xlu1 %753 }
 0x36b   : > { %1432 = vst.msk [vmem:[%s2374_s11 + $0x38] sm:$0xf] %vm674_vm1, %v760_v30  ;;  %1429 = vst.msk [vmem:[%s2374_s11 + $0x2c] sm:$0xf] %vm674_vm1, %v754_v31 }
 0x36c   : > { %881 = vrot.lane.b32.xlu1 %v2386_v7, %s1984_s19  ;;  %887 = vrot.lane.b32.xlu0 %v2396_v13, %s1984_s19 }
 0x36e   : > { %v785_v32 = vpop.permute.xlu0 %784  ;;  %v762_v33 = vpop.permute.xlu1 %761 }
 0x36f   : > { %1436 = vst.msk [vmem:[%s2527_s7 + $0x28] sm:$0xf] %vm674_vm1, %v785_v32  ;;  %1433 = vst.msk [vmem:[%s2374_s11 + $0x3c] sm:$0xf] %vm674_vm1, %v762_v33 }
 0x370   : > { %889 = vrot.lane.b32.xlu1 %v2410_v16, %s1984_s19  ;;  %912 = vrot.lane.b32.xlu0 %v2371_v1, %s1985_s15 }
 0x372   : > { %v793_v34 = vpop.permute.xlu0 %792  ;;  %v787_v35 = vpop.permute.xlu1 %786 }
 0x373   : > { %1440 = vst.msk [vmem:[%s2527_s7 + $0x38] sm:$0xf] %vm674_vm1, %v793_v34  ;;  %1437 = vst.msk [vmem:[%s2527_s7 + $0x2c] sm:$0xf] %vm674_vm1, %v787_v35 }
 0x374   : > { %914 = vrot.lane.b32.xlu1 %v2386_v7, %s1985_s15  ;;  %920 = vrot.lane.b32.xlu0 %v2396_v13, %s1985_s15 }
 0x376   : > { %v818_v20 = vpop.permute.xlu0 %817  ;;  %v795_v36 = vpop.permute.xlu1 %794 }
 0x377   : > { %1444 = vst.msk [vmem:[%s2544_s3 + $0x28] sm:$0xf] %vm674_vm1, %v818_v20  ;;  %1441 = vst.msk [vmem:[%s2527_s7 + $0x3c] sm:$0xf] %vm674_vm1, %v795_v36 }
 0x378   : > { %922 = vrot.lane.b32.xlu1 %v2410_v16, %s1985_s15  ;;  %945 = vrot.lane.b32.xlu0 %v2371_v1, %s1986_s22 }
 0x37a   : > { %v826_v37 = vpop.permute.xlu0 %825  ;;  %v820_v40 = vpop.permute.xlu1 %819 }
 0x37b   : > { %1448 = vst.msk [vmem:[%s2544_s3 + $0x38] sm:$0xf] %vm674_vm1, %v826_v37  ;;  %1445 = vst.msk [vmem:[%s2544_s3 + $0x2c] sm:$0xf] %vm674_vm1, %v820_v40 }
 0x37c   : > { %947 = vrot.lane.b32.xlu1 %v2386_v7, %s1986_s22  ;;  %953 = vrot.lane.b32.xlu0 %v2396_v13, %s1986_s22 }
 0x37e   : > { %v851_v41 = vpop.permute.xlu0 %850  ;;  %v828_v42 = vpop.permute.xlu1 %827 }
 0x37f   : > { %1452 = vst.msk [vmem:[%s2374_s11 + $0x48] sm:$0xf] %vm674_vm1, %v851_v41  ;;  %1449 = vst.msk [vmem:[%s2544_s3 + $0x3c] sm:$0xf] %vm674_vm1, %v828_v42 }
 0x380   : > { %955 = vrot.lane.b32.xlu1 %v2410_v16, %s1986_s22  ;;  %978 = vrot.lane.b32.xlu0 %v2371_v1, %s1987_s20 }
 0x382   : > { %v859_v43 = vpop.permute.xlu0 %858  ;;  %v853_v28 = vpop.permute.xlu1 %852 }
 0x383   : > { %1456 = vst.msk [vmem:[%s2374_s11 + $0x58] sm:$0xf] %vm674_vm1, %v859_v43  ;;  %1453 = vst.msk [vmem:[%s2374_s11 + $0x4c] sm:$0xf] %vm674_vm1, %v853_v28 }
 0x384   : > { %980 = vrot.lane.b32.xlu1 %v2386_v7, %s1987_s20  ;;  %986 = vrot.lane.b32.xlu0 %v2396_v13, %s1987_s20 }
 0x386   : > { %v884_v44 = vpop.permute.xlu0 %883  ;;  %v861_v21 = vpop.permute.xlu1 %860 }
 0x387   : > { %1460 = vst.msk [vmem:[%s2527_s7 + $0x48] sm:$0xf] %vm674_vm1, %v884_v44  ;;  %1457 = vst.msk [vmem:[%s2374_s11 + $0x5c] sm:$0xf] %vm674_vm1, %v861_v21 }
 0x388   : > { %988 = vrot.lane.b32.xlu1 %v2410_v16, %s1987_s20  ;;  %1011 = vrot.lane.b32.xlu0 %v2371_v1, %s1988_s17 }
 0x38a   : > { %v892_v45 = vpop.permute.xlu0 %891  ;;  %v886_v46 = vpop.permute.xlu1 %885 }
 0x38b   : > { %1464 = vst.msk [vmem:[%s2527_s7 + $0x58] sm:$0xf] %vm674_vm1, %v892_v45  ;;  %1461 = vst.msk [vmem:[%s2527_s7 + $0x4c] sm:$0xf] %vm674_vm1, %v886_v46 }
 0x38c   : > { %1013 = vrot.lane.b32.xlu1 %v2386_v7, %s1988_s17  ;;  %1019 = vrot.lane.b32.xlu0 %v2396_v13, %s1988_s17 }
 0x38e   : > { %v917_v47 = vpop.permute.xlu0 %916  ;;  %v894_v50 = vpop.permute.xlu1 %893 }
 0x38f   : > { %1468 = vst.msk [vmem:[%s2544_s3 + $0x48] sm:$0xf] %vm674_vm1, %v917_v47  ;;  %1465 = vst.msk [vmem:[%s2527_s7 + $0x5c] sm:$0xf] %vm674_vm1, %v894_v50 }
 0x390   : > { %1021 = vrot.lane.b32.xlu1 %v2410_v16, %s1988_s17  ;;  %1023 = vrot.lane.b32.xlu0 %v2391_v10, %s1988_s17 }
 0x392   : > { %v925_v29 = vpop.permute.xlu0 %924  ;;  %v919_v51 = vpop.permute.xlu1 %918 }
 0x393   : > { %1472 = vst.msk [vmem:[%s2544_s3 + $0x58] sm:$0xf] %vm674_vm1, %v925_v29  ;;  %1469 = vst.msk [vmem:[%s2544_s3 + $0x4c] sm:$0xf] %vm674_vm1, %v919_v51 }
 0x394   : > { %1025 = vrot.lane.b32.xlu1 %v2401_v15, %s1988_s17 }
 0x396   : > { %v950_v38 = vpop.permute.xlu0 %949  ;;  %v927_v52 = vpop.permute.xlu1 %926 }
 0x397   : > { %1476 = vst.msk [vmem:[%s2374_s11 + $0x68] sm:$0xf] %vm674_vm1, %v950_v38  ;;  %1473 = vst.msk [vmem:[%s2544_s3 + $0x5c] sm:$0xf] %vm674_vm1, %v927_v52 }
 0x39a   : > { %v958_v53 = vpop.permute.xlu0 %957  ;;  %v952_v54 = vpop.permute.xlu1 %951 }
 0x39b   : > { %1480 = vst.msk [vmem:[%s2374_s11 + $0x78] sm:$0xf] %vm674_vm1, %v958_v53  ;;  %1477 = vst.msk [vmem:[%s2374_s11 + $0x6c] sm:$0xf] %vm674_vm1, %v952_v54 }
 0x39e   : > { %v983_v39 = vpop.permute.xlu0 %982  ;;  %v960_v55 = vpop.permute.xlu1 %959 }
 0x39f   : > { %1484 = vst.msk [vmem:[%s2527_s7 + $0x68] sm:$0xf] %vm674_vm1, %v983_v39  ;;  %1481 = vst.msk [vmem:[%s2374_s11 + $0x7c] sm:$0xf] %vm674_vm1, %v960_v55 }
 0x3a2   : > { %v991_v56 = vpop.permute.xlu0 %990  ;;  %v985_v57 = vpop.permute.xlu1 %984 }
 0x3a3   : > { %1488 = vst.msk [vmem:[%s2527_s7 + $0x78] sm:$0xf] %vm674_vm1, %v991_v56  ;;  %1485 = vst.msk [vmem:[%s2527_s7 + $0x6c] sm:$0xf] %vm674_vm1, %v985_v57 }
 0x3a6   : > { %v1016_v48 = vpop.permute.xlu0 %1015  ;;  %v993_v58 = vpop.permute.xlu1 %992 }
 0x3a7   : > { %1492 = vst.msk [vmem:[%s2544_s3 + $0x68] sm:$0xf] %vm674_vm1, %v1016_v48  ;;  %1489 = vst.msk [vmem:[%s2527_s7 + $0x7c] sm:$0xf] %vm674_vm1, %v993_v58 }
 0x3aa   : > { %v684_v49 = vpop.permute.xlu0 %683  ;;  %v1018_v59 = vpop.permute.xlu1 %1017 }
 0x3ab   : > { %707 = vst.msk [vmem:[%s2527_s7] sm:$0xf] %vm674_vm1, %v684_v49  ;;  %1493 = vst.msk [vmem:[%s2544_s3 + $0x6c] sm:$0xf] %vm674_vm1, %v1018_v59 }
 0x3ae   : > { %v686_v60 = vpop.permute.xlu1 %685  ;;  %v692_v61 = vpop.permute.xlu0 %691 }
 0x3af   : > { %708 = vst.msk [vmem:[%s2527_s7 + $0x4] sm:$0xf] %vm674_vm1, %v686_v60  ;;  %711 = vst.msk [vmem:[%s2527_s7 + $0x10] sm:$0xf] %vm674_vm1, %v692_v61 }
 0x3b2   : > { %v694_v62 = vpop.permute.xlu1 %693  ;;  %v716_v63 = vpop.permute.xlu0 %715 }
 0x3b3   : > { %712 = vst.msk [vmem:[%s2527_s7 + $0x14] sm:$0xf] %vm674_vm1, %v694_v62  ;;  %739 = vst.msk [vmem:[%s2544_s3] sm:$0xf] %vm674_vm1, %v716_v63 }
 0x3b6   : > { %v718_v0 = vpop.permute.xlu1 %717  ;;  %v724_v1 = vpop.permute.xlu0 %723 }
 0x3b7   : > { %740 = vst.msk [vmem:[%s2544_s3 + $0x4] sm:$0xf] %vm674_vm1, %v718_v0  ;;  %743 = vst.msk [vmem:[%s2544_s3 + $0x10] sm:$0xf] %vm674_vm1, %v724_v1 }
 0x3ba   : > { %v726_v2 = vpop.permute.xlu1 %725  ;;  %v748_v3 = vpop.permute.xlu0 %747 }
 0x3bb   : > { %744 = vst.msk [vmem:[%s2544_s3 + $0x14] sm:$0xf] %vm674_vm1, %v726_v2  ;;  %1426 = vst.msk [vmem:[%s2374_s11 + $0x20] sm:$0xf] %vm674_vm1, %v748_v3 }
 0x3be   : > { %v750_v4 = vpop.permute.xlu1 %749  ;;  %v756_v5 = vpop.permute.xlu0 %755 }
 0x3bf   : > { %1427 = vst.msk [vmem:[%s2374_s11 + $0x24] sm:$0xf] %vm674_vm1, %v750_v4  ;;  %1430 = vst.msk [vmem:[%s2374_s11 + $0x30] sm:$0xf] %vm674_vm1, %v756_v5 }
 0x3c2   : > { %v758_v6 = vpop.permute.xlu1 %757  ;;  %v781_v7 = vpop.permute.xlu0 %780 }
 0x3c3   : > { %1431 = vst.msk [vmem:[%s2374_s11 + $0x34] sm:$0xf] %vm674_vm1, %v758_v6  ;;  %1434 = vst.msk [vmem:[%s2527_s7 + $0x20] sm:$0xf] %vm674_vm1, %v781_v7 }
 0x3c6   : > { %v783_v8 = vpop.permute.xlu1 %782  ;;  %v789_v9 = vpop.permute.xlu0 %788 }
 0x3c7   : > { %1435 = vst.msk [vmem:[%s2527_s7 + $0x24] sm:$0xf] %vm674_vm1, %v783_v8  ;;  %1438 = vst.msk [vmem:[%s2527_s7 + $0x30] sm:$0xf] %vm674_vm1, %v789_v9 }
 0x3ca   : > { %v791_v10 = vpop.permute.xlu1 %790  ;;  %v814_v11 = vpop.permute.xlu0 %813 }
 0x3cb   : > { %1439 = vst.msk [vmem:[%s2527_s7 + $0x34] sm:$0xf] %vm674_vm1, %v791_v10  ;;  %1442 = vst.msk [vmem:[%s2544_s3 + $0x20] sm:$0xf] %vm674_vm1, %v814_v11 }
 0x3ce   : > { %v816_v12 = vpop.permute.xlu1 %815  ;;  %v822_v13 = vpop.permute.xlu0 %821 }
 0x3cf   : > { %1443 = vst.msk [vmem:[%s2544_s3 + $0x24] sm:$0xf] %vm674_vm1, %v816_v12  ;;  %1446 = vst.msk [vmem:[%s2544_s3 + $0x30] sm:$0xf] %vm674_vm1, %v822_v13 }
 0x3d2   : > { %v824_v14 = vpop.permute.xlu1 %823  ;;  %v847_v15 = vpop.permute.xlu0 %846 }
 0x3d3   : > { %1447 = vst.msk [vmem:[%s2544_s3 + $0x34] sm:$0xf] %vm674_vm1, %v824_v14  ;;  %1450 = vst.msk [vmem:[%s2374_s11 + $0x40] sm:$0xf] %vm674_vm1, %v847_v15 }
 0x3d6   : > { %v849_v16 = vpop.permute.xlu1 %848  ;;  %v855_v17 = vpop.permute.xlu0 %854 }
 0x3d7   : > { %1451 = vst.msk [vmem:[%s2374_s11 + $0x44] sm:$0xf] %vm674_vm1, %v849_v16  ;;  %1454 = vst.msk [vmem:[%s2374_s11 + $0x50] sm:$0xf] %vm674_vm1, %v855_v17 }
 0x3da   : > { %v857_v18 = vpop.permute.xlu1 %856  ;;  %v880_v19 = vpop.permute.xlu0 %879 }
 0x3db   : > { %1455 = vst.msk [vmem:[%s2374_s11 + $0x54] sm:$0xf] %vm674_vm1, %v857_v18  ;;  %1458 = vst.msk [vmem:[%s2527_s7 + $0x40] sm:$0xf] %vm674_vm1, %v880_v19 }
 0x3de   : > { %v882_v22 = vpop.permute.xlu1 %881  ;;  %v888_v23 = vpop.permute.xlu0 %887 }
 0x3df   : > { %1459 = vst.msk [vmem:[%s2527_s7 + $0x44] sm:$0xf] %vm674_vm1, %v882_v22  ;;  %1462 = vst.msk [vmem:[%s2527_s7 + $0x50] sm:$0xf] %vm674_vm1, %v888_v23 }
 0x3e2   : > { %v890_v24 = vpop.permute.xlu1 %889  ;;  %v913_v25 = vpop.permute.xlu0 %912 }
 0x3e3   : > { %1463 = vst.msk [vmem:[%s2527_s7 + $0x54] sm:$0xf] %vm674_vm1, %v890_v24  ;;  %1466 = vst.msk [vmem:[%s2544_s3 + $0x40] sm:$0xf] %vm674_vm1, %v913_v25 }
 0x3e6   : > { %v915_v26 = vpop.permute.xlu1 %914  ;;  %v921_v27 = vpop.permute.xlu0 %920 }
 0x3e7   : > { %1467 = vst.msk [vmem:[%s2544_s3 + $0x44] sm:$0xf] %vm674_vm1, %v915_v26  ;;  %1470 = vst.msk [vmem:[%s2544_s3 + $0x50] sm:$0xf] %vm674_vm1, %v921_v27 }
 0x3ea   : > { %v923_v30 = vpop.permute.xlu1 %922  ;;  %v946_v31 = vpop.permute.xlu0 %945 }
 0x3eb   : > { %1471 = vst.msk [vmem:[%s2544_s3 + $0x54] sm:$0xf] %vm674_vm1, %v923_v30  ;;  %1474 = vst.msk [vmem:[%s2374_s11 + $0x60] sm:$0xf] %vm674_vm1, %v946_v31 }
 0x3ee   : > { %v948_v32 = vpop.permute.xlu1 %947  ;;  %v954_v33 = vpop.permute.xlu0 %953 }
 0x3ef   : > { %1475 = vst.msk [vmem:[%s2374_s11 + $0x64] sm:$0xf] %vm674_vm1, %v948_v32  ;;  %1478 = vst.msk [vmem:[%s2374_s11 + $0x70] sm:$0xf] %vm674_vm1, %v954_v33 }
 0x3f2   : > { %v956_v34 = vpop.permute.xlu1 %955  ;;  %v979_v35 = vpop.permute.xlu0 %978 }
 0x3f3   : > { %1479 = vst.msk [vmem:[%s2374_s11 + $0x74] sm:$0xf] %vm674_vm1, %v956_v34  ;;  %1482 = vst.msk [vmem:[%s2527_s7 + $0x60] sm:$0xf] %vm674_vm1, %v979_v35 }
 0x3f6   : > { %v981_v20 = vpop.permute.xlu1 %980  ;;  %v987_v36 = vpop.permute.xlu0 %986 }
 0x3f7   : > { %1483 = vst.msk [vmem:[%s2527_s7 + $0x64] sm:$0xf] %vm674_vm1, %v981_v20  ;;  %1486 = vst.msk [vmem:[%s2527_s7 + $0x70] sm:$0xf] %vm674_vm1, %v987_v36 }
 0x3fa   : > { %v989_v37 = vpop.permute.xlu1 %988  ;;  %v1012_v40 = vpop.permute.xlu0 %1011 }
 0x3fb   : > { %1487 = vst.msk [vmem:[%s2527_s7 + $0x74] sm:$0xf] %vm674_vm1, %v989_v37  ;;  %1490 = vst.msk [vmem:[%s2544_s3 + $0x60] sm:$0xf] %vm674_vm1, %v1012_v40 }
 0x3fe   : > { %v1014_v41 = vpop.permute.xlu1 %1013  ;;  %v1020_v42 = vpop.permute.xlu0 %1019 }
 0x3ff   : > { %1491 = vst.msk [vmem:[%s2544_s3 + $0x64] sm:$0xf] %vm674_vm1, %v1014_v41  ;;  %1494 = vst.msk [vmem:[%s2544_s3 + $0x70] sm:$0xf] %vm674_vm1, %v1020_v42 }
 0x402   : > { %v1022_v43 = vpop.permute.xlu1 %1021  ;;  %v1024_v28 = vpop.permute.xlu0 %1023 }
 0x403   : > { %1495 = vst.msk [vmem:[%s2544_s3 + $0x74] sm:$0xf] %vm674_vm1, %v1022_v43  ;;  %1496 = vst.msk [vmem:[%s2544_s3 + $0x78] sm:$0xf] %vm674_vm1, %v1024_v28 }
 0x406   : > { %v1026_v44 = vpop.permute.xlu1 %1025 }
 0x407   : > { %1497 = vst.msk [vmem:[%s2544_s3 + $0x7c] sm:$0xf] %vm674_vm1, %v1026_v44 }
 0x408   : > { %s1501_s13 = sshll.u32 %s1951_s27, 3  ;;  %s1502_s24 = sshll.u32 %s1955_s28, 6 }
 0x409   : > { %s1067_s12 = sadd.s32 %s1502_s24, %s1501_s13  ;;  %s1086_s18 = sshll.u32 %s2374_s11, 4  ;;  %s1087_s18 = int_to_ptr.vmem [resolvable:$true] %s1086_s18 }
 0x40a   : > { %s2779_s23 = sshll.u32 %s1067_s12, 6  ;;  %s1989_s19 = smov 512  }
 0x40b   : > { %s1069_s10 = scalar_lea.hbm %s2874_s5, %s2779_s23  ;;  %1560 = sst [smem:[#allocation16]] (%p2229_p4), %s1989_s19 }
 0x40c   : > { %s1990_s15 = smov 1024   ;;  %s1991_s27 = smov 8  }
 0x40d   : > { %1561 = sst [smem:[#allocation16 + $0x1]] (%p2229_p4), %s1990_s15  ;;  %s1992_s28 = smov 64  }
 0x40e   : > { %1562 = sst [smem:[#allocation16 + $0x2]] (%p2229_p4), %s1991_s27  ;;  %s1993_s11 = smov 4  }
 0x40f   : > { %1563 = sst [smem:[#allocation16 + $0x3]] (%p2229_p4), %s1992_s28  ;;  %s1994_s22 = smov [#allocation15]  }
 0x410   : > { %1564 = sst [smem:[#allocation16 + $0x4]] (%p2229_p4), %s1992_s28  ;;  %s1995_s20 = smov 0  }
 0x411   : > { %1565 = sst [smem:[#allocation16 + $0x5]] (%p2229_p4), %s1993_s11 }
 0x412   : > { %1566 = dma.general (%p2229_p4), %s1087_s18, 2048, %s1069_s10, %s1045_s16, %s1994_s22, [#allocation16], %s1995_s20, 0  }
 0x413   : > { %s2912_s13 = sld [smem:[#allocation33_spill]]  ;;  %s1133_s12 = sshll.u32 %s2527_s7, 4  ;;  %s1134_s12 = int_to_ptr.vmem [resolvable:$true] %s1133_s12 }
 0x414   : > { %s1996_s9 = smov 512   ;;  %s1997_s16 = smov 1024  }
 0x415   : > { %1567 = sst [smem:[#allocation18]] (%p2229_p4), %s1996_s9  ;;  %s1998_s18 = smov 8  }
 0x416   : > { %1568 = sst [smem:[#allocation18 + $0x1]] (%p2229_p4), %s1997_s16  ;;  %s1999_s21 = smov 64  }
 0x417   : > { %1569 = sst [smem:[#allocation18 + $0x2]] (%p2229_p4), %s1998_s18  ;;  %s2000_s10 = smov 4  }
 0x418   : > { %1570 = sst [smem:[#allocation18 + $0x3]] (%p2229_p4), %s1999_s21  ;;  %s2001_s19 = smov [#allocation17]  }
 0x419   : > { %s1116_s24 = scalar_lea.hbm %s2912_s13, %s2779_s23  ;;  %1571 = sst [smem:[#allocation18 + $0x4]] (%p2229_p4), %s1999_s21 }
 0x41a   : > { %1572 = sst [smem:[#allocation18 + $0x5]] (%p2229_p4), %s2000_s10  ;;  %s2002_s7 = smov 0  }
 0x41b   : > { %1573 = dma.general (%p2229_p4), %s1134_s12, 2048, %s1116_s24, %s2774_s6, %s2001_s19, [#allocation18], %s2002_s7, 0  }
 0x41c   : > { %s2913_s28 = sld [smem:[#allocation34_spill]]  ;;  %s1180_s22 = sshll.u32 %s2544_s3, 4  ;;  %s1181_s22 = int_to_ptr.vmem [resolvable:$true] %s1180_s22 }
 0x41d   : > { %s2003_s20 = smov 512   ;;  %s2004_s17 = smov 1024  }
 0x41e   : > { %1574 = sst [smem:[#allocation20]] (%p2229_p4), %s2003_s20  ;;  %s2005_s4 = smov 8  }
 0x41f   : > { %1575 = sst [smem:[#allocation20 + $0x1]] (%p2229_p4), %s2004_s17  ;;  %s2006_s13 = smov 64  }
 0x420   : > { %1576 = sst [smem:[#allocation20 + $0x2]] (%p2229_p4), %s2005_s4  ;;  %s2007_s24 = smov 4  }
 0x421   : > { %1577 = sst [smem:[#allocation20 + $0x3]] (%p2229_p4), %s2006_s13  ;;  %s2009_s3 = smov 0  }
 0x422   : > { %s1163_s11 = scalar_lea.hbm %s2913_s28, %s2779_s23  ;;  %1578 = sst [smem:[#allocation20 + $0x4]] (%p2229_p4), %s2006_s13 }
 0x423   : > { %1579 = sst [smem:[#allocation20 + $0x5]] (%p2229_p4), %s2007_s24  ;;  %s2008_s23 = smov [#allocation19]  }
 0x424   : > { %1580 = dma.general (%p2229_p4), %s1181_s22, 2048, %s1163_s11, %s2774_s6, %s2008_s23, [#allocation20], %s2009_s3, 0  }
 0x425 PF: > { %s2914_s12 = sld [smem:[#allocation26_spill]]  ;;  %s2915_s9 = sld [smem:[#allocation27_spill]] }
 0x426   : > { %p1620_p6 = scmp.ge.s32.totalorder %s1967_s8, 2 }
 0x42b   : > { %s1208_s16 = sand.u32 1, %s2914_s12   ;;  %p2916_p8 = scmp.ne.s32.totalorder %s2915_s9, 0 }
 0x42c   : > { %s1209_s18 = scalar_lea.sflag [#allocation4], %s1208_s16 }
 0x42d   : > { %p1602_p3 = pnand %p1620_p6, %p2916_p8 }
 0x42f   : > { %1930 = dma.done.wait (!%p1602_p3), %s1209_s18, 2048  }
 0x430   : > { %1932 = vsyncadd (!%p1602_p3), %s1209_s18, 4294965248  ;;  %s2917_s21 = sadd.s32 4294967294, %s1967_s8  }
 0x431   : > { %s1217_s10 = sand.u32 1, %s2917_s21  }
 0x432   : > { %s1218_s19 = scalar_lea.sflag [#allocation13], %s1217_s10 }
 0x433   : > { %1934 = dma.done.wait (!%p1602_p3), %s1218_s19, 4096  }
 0x434   : > { %1936 = vsyncadd (!%p1602_p3), %s1218_s19, 4294963200  ;;  %s29_s8 = sadd.s32 1, %s1967_s8   ;;  %s2918_s14 = sld [smem:[#allocation28_spill]] }
 0x435   : > { %p26_p4 = scmp.ge.s32.totalorder %s29_s8, 6   ;;  %s2919_s24 = smov %s1943_s25 }
 0x436   : > { %s2920_s25 = smov %s1947_s26  ;;  %s2921_s26 = smov %s2242_s2 }
 0x437   : > { %s2922_s27 = smov %s1959_s29  ;;  %s2923_s28 = smov %s1963_s30 }
 0x438   : > { %s2925_s30 = smov %s2931_s1  ;;  %28 = sbr.rel (!%p26_p4) target bundleno = 18 (0x12), region = 157 }
 0x43a   : > { %s2924_s29 = smov %s2918_s14 }
 0x43f   :  { %1232 = vsyncpa [#allocation3], 1 }
 0x440   :  { %1234 = vsyncpa [#allocation3 + $0x1], 1 }
 0x441   :  { %1235 = vsyncpa [#allocation6], 1 }
 0x442   :  { %1236 = vsyncpa [#allocation9], 1 }
 0x443   :  { %1237 = vsyncpa [#allocation4], 1 }
 0x444   :  { %1239 = vsyncpa [#allocation4 + $0x1], 1 }
 0x445   :  { %1240 = vsyncpa [#allocation13], 1 }
 0x446   :  { %1242 = vsyncpa [#allocation13 + $0x1], 1 }

</bundles_post_ra>
